<compile_context>
chip_gen: v7x
topology: tpu7x:2x2x1
jax: 0.10.0
libtpu: 0.0.40
codegen_flags: <defaults>
</compile_context>

<pallas_src>
import functools

import jax
import jax.numpy as jnp
from jax.experimental import pallas as pl
from jax.experimental.pallas import tpu as pltpu


_PARALLEL_1D = pltpu.CompilerParams(dimension_semantics=("parallel",))


# ----------------------------------------------------------------------------
# In-kernel helpers
# ----------------------------------------------------------------------------
def _layer_norm_rows(h, g, b, eps):
    # PyTorch LayerNorm semantics: biased variance over the last dim.
    mu = jnp.mean(h, axis=-1, keepdims=True)
    var = jnp.mean((h - mu) ** 2, axis=-1, keepdims=True)
    return (h - mu) * jax.lax.rsqrt(var + eps) * g + b


def _per_head_attention(q, k, v, num_heads, head_dim, want_probs):
    """q:(T,H*d) (pre-scaled), k/v:(S,H*d). Returns ctx (T,H*d) and summed probs."""
    ctx_heads = []
    p_sum = None
    for h in range(num_heads):
        sl = slice(h * head_dim, (h + 1) * head_dim)
        qh, kh, vh = q[:, sl], k[:, sl], v[:, sl]
        # contract on the last axes (q @ k^T) without an explicit transpose.
        s = jax.lax.dot_general(qh, kh, (((1,), (1,)), ((), ())),
                                preferred_element_type=jnp.float32)      # (T, S)
        s = s - jnp.max(s, axis=-1, keepdims=True)
        e = jnp.exp(s)
        p = e * pl.reciprocal(jnp.sum(e, axis=-1, keepdims=True), approx=True)
        if want_probs:
            p_sum = p if p_sum is None else p_sum + p
        ctx_heads.append(jnp.dot(p, vh, preferred_element_type=jnp.float32))
    ctx = jnp.concatenate(ctx_heads, axis=1)                              # (T, H*d)
    return ctx, p_sum


# ----------------------------------------------------------------------------
# Pallas kernels (one fused kernel per residual block)
# ----------------------------------------------------------------------------
def _self_attn_block_kernel(x_ref, wqkv_ref, bqkv_ref, wo_ref, bo_ref,
                            g_ref, b_ref, o_ref,
                            *, num_heads, head_dim, scale, eps):
    x = x_ref[0].astype(jnp.float32)                                      # (T, E)
    qkv = jnp.dot(x, wqkv_ref[...],
                  preferred_element_type=jnp.float32) + bqkv_ref[...]     # (T, 3*D)
    d_model = num_heads * head_dim
    q = qkv[:, :d_model] * scale
    k = qkv[:, d_model:2 * d_model]
    v = qkv[:, 2 * d_model:]
    ctx, _ = _per_head_attention(q, k, v, num_heads, head_dim, want_probs=False)
    attn_out = jnp.dot(ctx, wo_ref[...],
                       preferred_element_type=jnp.float32) + bo_ref[...]  # (T, E)
    y = _layer_norm_rows(attn_out + x, g_ref[...], b_ref[...], eps)
    o_ref[0] = y.astype(o_ref.dtype)


def _enc_attn_block_kernel(x_ref, enc_ref, wq_ref, bq_ref, wkv_ref, bkv_ref,
                           wo_ref, bo_ref, g_ref, b_ref, o_ref, attn_ref,
                           *, num_heads, head_dim, scale, eps):
    x = x_ref[0].astype(jnp.float32)                                      # (T, E)
    enc = enc_ref[0].astype(jnp.float32)                                  # (S, E_kv)
    d_model = num_heads * head_dim
    q = (jnp.dot(x, wq_ref[...], preferred_element_type=jnp.float32)
         + bq_ref[...]) * scale                                           # (T, D)
    kv = jnp.dot(enc, wkv_ref[...],
                 preferred_element_type=jnp.float32) + bkv_ref[...]       # (S, 2*D)
    k = kv[:, :d_model]
    v = kv[:, d_model:]
    ctx, p_sum = _per_head_attention(q, k, v, num_heads, head_dim, want_probs=True)
    attn_out = jnp.dot(ctx, wo_ref[...],
                       preferred_element_type=jnp.float32) + bo_ref[...]  # (T, E)
    y = _layer_norm_rows(attn_out + x, g_ref[...], b_ref[...], eps)
    o_ref[0] = y.astype(o_ref.dtype)
    attn_ref[0] = (p_sum * (1.0 / num_heads)).astype(attn_ref.dtype)


def _ffn_block_kernel(x_ref, w1_ref, b1_ref, w2_ref, b2_ref, g_ref, b_ref,
                      o_ref, *, eps):
    x = x_ref[...].astype(jnp.float32)                                    # (tm, E)
    h = jnp.maximum(
        jnp.dot(x, w1_ref[...], preferred_element_type=jnp.float32) + b1_ref[...],
        0.0)                                                              # (tm, F)
    y = jnp.dot(h, w2_ref[...],
                preferred_element_type=jnp.float32) + b2_ref[...]         # (tm, E)
    o_ref[...] = _layer_norm_rows(y + x, g_ref[...], b_ref[...], eps).astype(o_ref.dtype)


# ----------------------------------------------------------------------------
# pallas_call wrappers
# ----------------------------------------------------------------------------
def self_attn_block(x_bte, p, gamma, beta, num_heads, eps=1e-5):
    B, T, E = x_bte.shape
    three_d = p["wqkv_t"].shape[1]
    d_model = three_d // 3
    head_dim = d_model // num_heads
    kernel = functools.partial(_self_attn_block_kernel, num_heads=num_heads,
                               head_dim=head_dim, scale=head_dim ** -0.5, eps=eps)
    return pl.pallas_call(
        kernel,
        out_shape=jax.ShapeDtypeStruct((B, T, E), x_bte.dtype),
        grid=(B,),
        in_specs=[
            pl.BlockSpec((1, T, E), lambda i: (i, 0, 0)),
            pl.BlockSpec((E, three_d), lambda i: (0, 0)),
            pl.BlockSpec((1, three_d), lambda i: (0, 0)),
            pl.BlockSpec((d_model, E), lambda i: (0, 0)),
            pl.BlockSpec((1, E), lambda i: (0, 0)),
            pl.BlockSpec((1, E), lambda i: (0, 0)),
            pl.BlockSpec((1, E), lambda i: (0, 0)),
        ],
        out_specs=pl.BlockSpec((1, T, E), lambda i: (i, 0, 0)),
        compiler_params=_PARALLEL_1D,
    )(x_bte, p["wqkv_t"], p["bqkv"].reshape(1, three_d),
      p["wo_t"], p["bo"].reshape(1, E),
      gamma.reshape(1, E), beta.reshape(1, E))


def enc_attn_block(x_bte, enc_bse, p, gamma, beta, num_heads, eps=1e-5):
    B, T, E = x_bte.shape
    S, E_kv = enc_bse.shape[1], enc_bse.shape[2]
    d_model = p["wq_t"].shape[1]
    two_d = p["wkv_t"].shape[1]
    head_dim = d_model // num_heads
    kernel = functools.partial(_enc_attn_block_kernel, num_heads=num_heads,
                               head_dim=head_dim, scale=head_dim ** -0.5, eps=eps)
    return pl.pallas_call(
        kernel,
        out_shape=(jax.ShapeDtypeStruct((B, T, E), x_bte.dtype),
                   jax.ShapeDtypeStruct((B, T, S), jnp.float32)),
        grid=(B,),
        in_specs=[
            pl.BlockSpec((1, T, E), lambda i: (i, 0, 0)),
            pl.BlockSpec((1, S, E_kv), lambda i: (i, 0, 0)),
            pl.BlockSpec((E, d_model), lambda i: (0, 0)),
            pl.BlockSpec((1, d_model), lambda i: (0, 0)),
            pl.BlockSpec((E_kv, two_d), lambda i: (0, 0)),
            pl.BlockSpec((1, two_d), lambda i: (0, 0)),
            pl.BlockSpec((d_model, E), lambda i: (0, 0)),
            pl.BlockSpec((1, E), lambda i: (0, 0)),
            pl.BlockSpec((1, E), lambda i: (0, 0)),
            pl.BlockSpec((1, E), lambda i: (0, 0)),
        ],
        out_specs=(pl.BlockSpec((1, T, E), lambda i: (i, 0, 0)),
                   pl.BlockSpec((1, T, S), lambda i: (i, 0, 0))),
        compiler_params=_PARALLEL_1D,
    )(x_bte, enc_bse, p["wq_t"], p["bq"].reshape(1, d_model),
      p["wkv_t"], p["bkv"].reshape(1, two_d),
      p["wo_t"], p["bo"].reshape(1, E),
      gamma.reshape(1, E), beta.reshape(1, E))


def ffn_block(x2d, p, gamma, beta, eps=1e-5, row_tile=256):
    M, E = x2d.shape
    Fdim = p["fc1_wt"].shape[1]
    tm = min(M, row_tile)
    kernel = functools.partial(_ffn_block_kernel, eps=eps)
    return pl.pallas_call(
        kernel,
        out_shape=jax.ShapeDtypeStruct((M, E), x2d.dtype),
        grid=(pl.cdiv(M, tm),),
        in_specs=[
            pl.BlockSpec((tm, E), lambda i: (i, 0)),
            pl.BlockSpec((E, Fdim), lambda i: (0, 0)),
            pl.BlockSpec((1, Fdim), lambda i: (0, 0)),
            pl.BlockSpec((Fdim, E), lambda i: (0, 0)),
            pl.BlockSpec((1, E), lambda i: (0, 0)),
            pl.BlockSpec((1, E), lambda i: (0, 0)),
            pl.BlockSpec((1, E), lambda i: (0, 0)),
        ],
        out_specs=pl.BlockSpec((tm, E), lambda i: (i, 0)),
        compiler_params=_PARALLEL_1D,
    )(x2d, p["fc1_wt"], p["fc1_b"].reshape(1, Fdim),
      p["fc2_wt"], p["fc2_b"].reshape(1, E),
      gamma.reshape(1, E), beta.reshape(1, E))


# ----------------------------------------------------------------------------
# Full decoder-layer forward (post-norm, eval mode: dropout = identity)
# ----------------------------------------------------------------------------
@functools.partial(jax.jit, static_argnames=("num_heads",))
def transformer_decoder_layer_forward(x, encoder_out, params, *, num_heads):
    T, B, E = x.shape
    # One layout change on entry / exit; everything between the 3 fused kernels
    # stays in (B, T, E) / (B*T, E) with no intermediate HBM transposes.
    x_bte = jnp.transpose(x, (1, 0, 2))
    enc_bse = jnp.transpose(encoder_out, (1, 0, 2))

    # --- self-attention block (sample_idx = 0) + residual + LN1 ---
    y = self_attn_block(x_bte, params["self_attn"],
                        params["ln1_g"], params["ln1_b"], num_heads)
    # --- encoder-decoder attention block + residual + LN2 (returns avg probs) ---
    z, attn = enc_attn_block(y, enc_bse, params["enc_attn"],
                             params["ln2_g"], params["ln2_b"], num_heads)
    # --- mlp_ffn: fc1 -> relu -> fc2, + residual + LN3 ---
    out = ffn_block(z.reshape(B * T, E), params["ffn"],
                    params["ln3_g"], params["ln3_b"]).reshape(B, T, E)
    return jnp.transpose(out, (1, 0, 2)), attn


# ----------------------------------------------------------------------------
# Deterministic parameter construction (weights stored pre-transposed / fused)
# ----------------------------------------------------------------------------
def make_params(key, embed_dim, enc_embed_dim, ffn_dim, qkv_dim, num_heads):
    del num_heads  # head count only affects the reshape, not parameter shapes
    keys = iter(jax.random.split(key, 16))

    def w(shape):
        return jax.random.normal(next(keys), shape, jnp.float32) * 0.02

    def zeros(n):
        return jnp.zeros((n,), jnp.float32)

    # Self-attention: Q/K/V weights fused and pre-transposed to (E, 3*qkv).
    wq, wk, wv = w((qkv_dim, embed_dim)), w((qkv_dim, embed_dim)), w((qkv_dim, embed_dim))
    wo = w((embed_dim, qkv_dim))
    self_attn = {
        "wqkv_t": jnp.concatenate([wq.T, wk.T, wv.T], axis=1),
        "bqkv": zeros(3 * qkv_dim),
        "wo_t": wo.T,
        "bo": zeros(embed_dim),
    }
    # Encoder-decoder attention: Q from decoder (E), fused K/V from encoder (E_kv).
    ewq = w((qkv_dim, embed_dim))
    ewk, ewv = w((qkv_dim, enc_embed_dim)), w((qkv_dim, enc_embed_dim))
    ewo = w((embed_dim, qkv_dim))
    enc_attn = {
        "wq_t": ewq.T, "bq": zeros(qkv_dim),
        "wkv_t": jnp.concatenate([ewk.T, ewv.T], axis=1),
        "bkv": zeros(2 * qkv_dim),
        "wo_t": ewo.T, "bo": zeros(embed_dim),
    }
    ffn = {
        "fc1_wt": w((ffn_dim, embed_dim)).T,   # (E, F)
        "fc1_b": zeros(ffn_dim),
        "fc2_wt": w((embed_dim, ffn_dim)).T,   # (F, E)
        "fc2_b": zeros(embed_dim),
    }
    return {
        "self_attn": self_attn,
        "enc_attn": enc_attn,
        "ffn": ffn,
        "ln1_g": jnp.ones((embed_dim,), jnp.float32), "ln1_b": zeros(embed_dim),
        "ln2_g": jnp.ones((embed_dim,), jnp.float32), "ln2_b": zeros(embed_dim),
        "ln3_g": jnp.ones((embed_dim,), jnp.float32), "ln3_b": zeros(embed_dim),
    }


if __name__ == "__main__":
    T, S, B = 8, 8, 2            # tgt seq, src seq, batch
    E, FFN, H = 32, 64, 4        # decoder_embed_dim, decoder_ffn_embed_dim, heads
    QKV = E                      # qkv_dim == embed_dim

    root = jax.random.PRNGKey(0)
    k_x, k_enc, k_p = jax.random.split(root, 3)
    x = jax.random.normal(k_x, (T, B, E), jnp.float32)            # (seq, batch, embed)
    encoder_out = jax.random.normal(k_enc, (S, B, E), jnp.float32)
    params = make_params(k_p, E, E, FFN, QKV, H)

    out, attn = transformer_decoder_layer_forward(x, encoder_out, params,
                                                  num_heads=H)
    out = jax.block_until_ready(out)
    attn = jax.block_until_ready(attn)

    assert out.shape == (T, B, E)
    assert attn.shape == (B, T, S)
    assert bool(jnp.all(jnp.isfinite(out)))
    assert bool(jnp.all(jnp.isfinite(attn)))
    print("KERNEL_OK")
</pallas_src>

<mosaic_0001>
module attributes {stable_mosaic.version = 11 : i64} {
  func.func @_enc_attn_block_kernel(%arg0: i32, %arg1: memref<1x8x32xf32, #tpu.memory_space<vmem>>, %arg2: memref<1x8x32xf32, #tpu.memory_space<vmem>>, %arg3: memref<32x32xf32, #tpu.memory_space<vmem>>, %arg4: memref<1x32xf32, #tpu.memory_space<vmem>>, %arg5: memref<32x64xf32, #tpu.memory_space<vmem>>, %arg6: memref<1x64xf32, #tpu.memory_space<vmem>>, %arg7: memref<32x32xf32, #tpu.memory_space<vmem>>, %arg8: memref<1x32xf32, #tpu.memory_space<vmem>>, %arg9: memref<1x32xf32, #tpu.memory_space<vmem>>, %arg10: memref<1x32xf32, #tpu.memory_space<vmem>>, %arg11: memref<1x8x32xf32, #tpu.memory_space<vmem>>, %arg12: memref<1x8x8xf32, #tpu.memory_space<vmem>>) attributes {dimension_semantics = [#tpu.dimension_semantics<parallel>], iteration_bounds = array<i64: 2>, scalar_prefetch = 0 : i64, scratch_operands = 0 : i64, tpu.core_type = #tpu.core_type<tc>, window_params = [{transform_indices = @transform_0, window_bounds = array<i64: 1, 8, 32>}, {transform_indices = @transform_1, window_bounds = array<i64: 1, 8, 32>}, {pipeline_mode = #tpu.pipeline_mode<synchronous>, transform_indices = @transform_2, window_bounds = array<i64: 32, 32>}, {pipeline_mode = #tpu.pipeline_mode<synchronous>, transform_indices = @transform_3, window_bounds = array<i64: 1, 32>}, {pipeline_mode = #tpu.pipeline_mode<synchronous>, transform_indices = @transform_4, window_bounds = array<i64: 32, 64>}, {pipeline_mode = #tpu.pipeline_mode<synchronous>, transform_indices = @transform_5, window_bounds = array<i64: 1, 64>}, {pipeline_mode = #tpu.pipeline_mode<synchronous>, transform_indices = @transform_6, window_bounds = array<i64: 32, 32>}, {pipeline_mode = #tpu.pipeline_mode<synchronous>, transform_indices = @transform_7, window_bounds = array<i64: 1, 32>}, {pipeline_mode = #tpu.pipeline_mode<synchronous>, transform_indices = @transform_8, window_bounds = array<i64: 1, 32>}, {pipeline_mode = #tpu.pipeline_mode<synchronous>, transform_indices = @transform_9, window_bounds = array<i64: 1, 32>}, {transform_indices = @transform_10, window_bounds = array<i64: 1, 8, 32>}, {transform_indices = @transform_11, window_bounds = array<i64: 1, 8, 8>}]} {
    %c0 = arith.constant 0 : index
    %c0_0 = arith.constant 0 : index
    %c0_1 = arith.constant 0 : index
    %0 = vector.load %arg1[%c0, %c0_0, %c0_1] : memref<1x8x32xf32, #tpu.memory_space<vmem>>, vector<1x8x32xf32>
    %1 = vector.shape_cast %0 : vector<1x8x32xf32> to vector<8x32xf32>
    %c0_2 = arith.constant 0 : index
    %c0_3 = arith.constant 0 : index
    %c0_4 = arith.constant 0 : index
    %2 = vector.load %arg2[%c0_2, %c0_3, %c0_4] : memref<1x8x32xf32, #tpu.memory_space<vmem>>, vector<1x8x32xf32>
    %3 = vector.shape_cast %2 : vector<1x8x32xf32> to vector<8x32xf32>
    %c0_5 = arith.constant 0 : index
    %c0_6 = arith.constant 0 : index
    %4 = vector.load %arg3[%c0_5, %c0_6] : memref<32x32xf32, #tpu.memory_space<vmem>>, vector<32x32xf32>
    %cst = arith.constant dense<0.000000e+00> : vector<8x32xf32>
    %5 = tpu.matmul %1, %4, %cst {dimension_numbers = #tpu.dot_dimension_numbers<[1], [0], [0], [1], [0, 0, 1, 1], [], []>} : vector<8x32xf32>, vector<32x32xf32>, vector<8x32xf32> -> vector<8x32xf32>
    %c0_7 = arith.constant 0 : index
    %c0_8 = arith.constant 0 : index
    %6 = vector.load %arg4[%c0_7, %c0_8] : memref<1x32xf32, #tpu.memory_space<vmem>>, vector<1x32xf32>
    %7 = vector.broadcast %6 : vector<1x32xf32> to vector<8x32xf32>
    %8 = arith.addf %5, %7 : vector<8x32xf32>
    %cst_9 = arith.constant 0.353553385 : f32
    %9 = vector.broadcast %cst_9 : f32 to vector<8x32xf32>
    %10 = arith.mulf %8, %9 : vector<8x32xf32>
    %c0_10 = arith.constant 0 : index
    %c0_11 = arith.constant 0 : index
    %11 = vector.load %arg5[%c0_10, %c0_11] : memref<32x64xf32, #tpu.memory_space<vmem>>, vector<32x64xf32>
    %cst_12 = arith.constant dense<0.000000e+00> : vector<8x64xf32>
    %12 = tpu.matmul %3, %11, %cst_12 {dimension_numbers = #tpu.dot_dimension_numbers<[1], [0], [0], [1], [0, 0, 1, 1], [], []>} : vector<8x32xf32>, vector<32x64xf32>, vector<8x64xf32> -> vector<8x64xf32>
    %c0_13 = arith.constant 0 : index
    %c0_14 = arith.constant 0 : index
    %13 = vector.load %arg6[%c0_13, %c0_14] : memref<1x64xf32, #tpu.memory_space<vmem>>, vector<1x64xf32>
    %14 = vector.broadcast %13 : vector<1x64xf32> to vector<8x64xf32>
    %15 = arith.addf %12, %14 : vector<8x64xf32>
    %16 = vector.extract_strided_slice %15 {offsets = [0, 0], sizes = [8, 32], strides = [1, 1]} : vector<8x64xf32> to vector<8x32xf32>
    %17 = vector.extract_strided_slice %15 {offsets = [0, 32], sizes = [8, 32], strides = [1, 1]} : vector<8x64xf32> to vector<8x32xf32>
    %18 = vector.extract_strided_slice %10 {offsets = [0, 0], sizes = [8, 8], strides = [1, 1]} : vector<8x32xf32> to vector<8x8xf32>
    %19 = vector.extract_strided_slice %16 {offsets = [0, 0], sizes = [8, 8], strides = [1, 1]} : vector<8x32xf32> to vector<8x8xf32>
    %20 = vector.extract_strided_slice %17 {offsets = [0, 0], sizes = [8, 8], strides = [1, 1]} : vector<8x32xf32> to vector<8x8xf32>
    %cst_15 = arith.constant dense<0.000000e+00> : vector<8x8xf32>
    %21 = tpu.matmul %18, %19, %cst_15 {dimension_numbers = #tpu.dot_dimension_numbers<[1], [1], [0], [0], [0, 0, 1, 0], [], []>} : vector<8x8xf32>, vector<8x8xf32>, vector<8x8xf32> -> vector<8x8xf32>
    %cst_16 = arith.constant dense<0xFF800000> : vector<8xf32>
    %22 = vector.multi_reduction <maximumf>, %21, %cst_16 [1] : vector<8x8xf32> to vector<8xf32>
    %23 = vector.shape_cast %22 : vector<8xf32> to vector<8x1xf32>
    %24 = vector.broadcast %23 : vector<8x1xf32> to vector<8x8xf32>
    %25 = arith.subf %21, %24 : vector<8x8xf32>
    %26 = math.exp %25 : vector<8x8xf32>
    %cst_17 = arith.constant dense<0.000000e+00> : vector<8xf32>
    %27 = vector.multi_reduction <add>, %26, %cst_17 [1] : vector<8x8xf32> to vector<8xf32>
    %28 = vector.shape_cast %27 : vector<8xf32> to vector<8x1xf32>
    %29 = tpu.reciprocal %28 {approx = true} : vector<8x1xf32> -> vector<8x1xf32>
    %30 = vector.broadcast %29 : vector<8x1xf32> to vector<8x8xf32>
    %31 = arith.mulf %26, %30 : vector<8x8xf32>
    %cst_18 = arith.constant dense<0.000000e+00> : vector<8x8xf32>
    %32 = tpu.matmul %31, %20, %cst_18 {dimension_numbers = #tpu.dot_dimension_numbers<[1], [0], [0], [1], [0, 0, 1, 1], [], []>} : vector<8x8xf32>, vector<8x8xf32>, vector<8x8xf32> -> vector<8x8xf32>
    %33 = vector.extract_strided_slice %10 {offsets = [0, 8], sizes = [8, 8], strides = [1, 1]} : vector<8x32xf32> to vector<8x8xf32>
    %34 = vector.extract_strided_slice %16 {offsets = [0, 8], sizes = [8, 8], strides = [1, 1]} : vector<8x32xf32> to vector<8x8xf32>
    %35 = vector.extract_strided_slice %17 {offsets = [0, 8], sizes = [8, 8], strides = [1, 1]} : vector<8x32xf32> to vector<8x8xf32>
    %cst_19 = arith.constant dense<0.000000e+00> : vector<8x8xf32>
    %36 = tpu.matmul %33, %34, %cst_19 {dimension_numbers = #tpu.dot_dimension_numbers<[1], [1], [0], [0], [0, 0, 1, 0], [], []>} : vector<8x8xf32>, vector<8x8xf32>, vector<8x8xf32> -> vector<8x8xf32>
    %cst_20 = arith.constant dense<0xFF800000> : vector<8xf32>
    %37 = vector.multi_reduction <maximumf>, %36, %cst_20 [1] : vector<8x8xf32> to vector<8xf32>
    %38 = vector.shape_cast %37 : vector<8xf32> to vector<8x1xf32>
    %39 = vector.broadcast %38 : vector<8x1xf32> to vector<8x8xf32>
    %40 = arith.subf %36, %39 : vector<8x8xf32>
    %41 = math.exp %40 : vector<8x8xf32>
    %cst_21 = arith.constant dense<0.000000e+00> : vector<8xf32>
    %42 = vector.multi_reduction <add>, %41, %cst_21 [1] : vector<8x8xf32> to vector<8xf32>
    %43 = vector.shape_cast %42 : vector<8xf32> to vector<8x1xf32>
    %44 = tpu.reciprocal %43 {approx = true} : vector<8x1xf32> -> vector<8x1xf32>
    %45 = vector.broadcast %44 : vector<8x1xf32> to vector<8x8xf32>
    %46 = arith.mulf %41, %45 : vector<8x8xf32>
    %47 = arith.addf %31, %46 : vector<8x8xf32>
    %cst_22 = arith.constant dense<0.000000e+00> : vector<8x8xf32>
    %48 = tpu.matmul %46, %35, %cst_22 {dimension_numbers = #tpu.dot_dimension_numbers<[1], [0], [0], [1], [0, 0, 1, 1], [], []>} : vector<8x8xf32>, vector<8x8xf32>, vector<8x8xf32> -> vector<8x8xf32>
    %49 = vector.extract_strided_slice %10 {offsets = [0, 16], sizes = [8, 8], strides = [1, 1]} : vector<8x32xf32> to vector<8x8xf32>
    %50 = vector.extract_strided_slice %16 {offsets = [0, 16], sizes = [8, 8], strides = [1, 1]} : vector<8x32xf32> to vector<8x8xf32>
    %51 = vector.extract_strided_slice %17 {offsets = [0, 16], sizes = [8, 8], strides = [1, 1]} : vector<8x32xf32> to vector<8x8xf32>
    %cst_23 = arith.constant dense<0.000000e+00> : vector<8x8xf32>
    %52 = tpu.matmul %49, %50, %cst_23 {dimension_numbers = #tpu.dot_dimension_numbers<[1], [1], [0], [0], [0, 0, 1, 0], [], []>} : vector<8x8xf32>, vector<8x8xf32>, vector<8x8xf32> -> vector<8x8xf32>
    %cst_24 = arith.constant dense<0xFF800000> : vector<8xf32>
    %53 = vector.multi_reduction <maximumf>, %52, %cst_24 [1] : vector<8x8xf32> to vector<8xf32>
    %54 = vector.shape_cast %53 : vector<8xf32> to vector<8x1xf32>
    %55 = vector.broadcast %54 : vector<8x1xf32> to vector<8x8xf32>
    %56 = arith.subf %52, %55 : vector<8x8xf32>
    %57 = math.exp %56 : vector<8x8xf32>
    %cst_25 = arith.constant dense<0.000000e+00> : vector<8xf32>
    %58 = vector.multi_reduction <add>, %57, %cst_25 [1] : vector<8x8xf32> to vector<8xf32>
    %59 = vector.shape_cast %58 : vector<8xf32> to vector<8x1xf32>
    %60 = tpu.reciprocal %59 {approx = true} : vector<8x1xf32> -> vector<8x1xf32>
    %61 = vector.broadcast %60 : vector<8x1xf32> to vector<8x8xf32>
    %62 = arith.mulf %57, %61 : vector<8x8xf32>
    %63 = arith.addf %47, %62 : vector<8x8xf32>
    %cst_26 = arith.constant dense<0.000000e+00> : vector<8x8xf32>
    %64 = tpu.matmul %62, %51, %cst_26 {dimension_numbers = #tpu.dot_dimension_numbers<[1], [0], [0], [1], [0, 0, 1, 1], [], []>} : vector<8x8xf32>, vector<8x8xf32>, vector<8x8xf32> -> vector<8x8xf32>
    %65 = vector.extract_strided_slice %10 {offsets = [0, 24], sizes = [8, 8], strides = [1, 1]} : vector<8x32xf32> to vector<8x8xf32>
    %66 = vector.extract_strided_slice %16 {offsets = [0, 24], sizes = [8, 8], strides = [1, 1]} : vector<8x32xf32> to vector<8x8xf32>
    %67 = vector.extract_strided_slice %17 {offsets = [0, 24], sizes = [8, 8], strides = [1, 1]} : vector<8x32xf32> to vector<8x8xf32>
    %cst_27 = arith.constant dense<0.000000e+00> : vector<8x8xf32>
    %68 = tpu.matmul %65, %66, %cst_27 {dimension_numbers = #tpu.dot_dimension_numbers<[1], [1], [0], [0], [0, 0, 1, 0], [], []>} : vector<8x8xf32>, vector<8x8xf32>, vector<8x8xf32> -> vector<8x8xf32>
    %cst_28 = arith.constant dense<0xFF800000> : vector<8xf32>
    %69 = vector.multi_reduction <maximumf>, %68, %cst_28 [1] : vector<8x8xf32> to vector<8xf32>
    %70 = vector.shape_cast %69 : vector<8xf32> to vector<8x1xf32>
    %71 = vector.broadcast %70 : vector<8x1xf32> to vector<8x8xf32>
    %72 = arith.subf %68, %71 : vector<8x8xf32>
    %73 = math.exp %72 : vector<8x8xf32>
    %cst_29 = arith.constant dense<0.000000e+00> : vector<8xf32>
    %74 = vector.multi_reduction <add>, %73, %cst_29 [1] : vector<8x8xf32> to vector<8xf32>
    %75 = vector.shape_cast %74 : vector<8xf32> to vector<8x1xf32>
    %76 = tpu.reciprocal %75 {approx = true} : vector<8x1xf32> -> vector<8x1xf32>
    %77 = vector.broadcast %76 : vector<8x1xf32> to vector<8x8xf32>
    %78 = arith.mulf %73, %77 : vector<8x8xf32>
    %79 = arith.addf %63, %78 : vector<8x8xf32>
    %cst_30 = arith.constant dense<0.000000e+00> : vector<8x8xf32>
    %80 = tpu.matmul %78, %67, %cst_30 {dimension_numbers = #tpu.dot_dimension_numbers<[1], [0], [0], [1], [0, 0, 1, 1], [], []>} : vector<8x8xf32>, vector<8x8xf32>, vector<8x8xf32> -> vector<8x8xf32>
    %81 = tpu.concatenate %32, %48, %64, %80 in 1 : vector<8x8xf32>, vector<8x8xf32>, vector<8x8xf32>, vector<8x8xf32> -> vector<8x32xf32>
    %c0_31 = arith.constant 0 : index
    %c0_32 = arith.constant 0 : index
    %82 = vector.load %arg7[%c0_31, %c0_32] : memref<32x32xf32, #tpu.memory_space<vmem>>, vector<32x32xf32>
    %cst_33 = arith.constant dense<0.000000e+00> : vector<8x32xf32>
    %83 = tpu.matmul %81, %82, %cst_33 {dimension_numbers = #tpu.dot_dimension_numbers<[1], [0], [0], [1], [0, 0, 1, 1], [], []>} : vector<8x32xf32>, vector<32x32xf32>, vector<8x32xf32> -> vector<8x32xf32>
    %c0_34 = arith.constant 0 : index
    %c0_35 = arith.constant 0 : index
    %84 = vector.load %arg8[%c0_34, %c0_35] : memref<1x32xf32, #tpu.memory_space<vmem>>, vector<1x32xf32>
    %85 = vector.broadcast %84 : vector<1x32xf32> to vector<8x32xf32>
    %86 = arith.addf %83, %85 : vector<8x32xf32>
    %87 = arith.addf %86, %1 : vector<8x32xf32>
    %c0_36 = arith.constant 0 : index
    %c0_37 = arith.constant 0 : index
    %88 = vector.load %arg9[%c0_36, %c0_37] : memref<1x32xf32, #tpu.memory_space<vmem>>, vector<1x32xf32>
    %c0_38 = arith.constant 0 : index
    %c0_39 = arith.constant 0 : index
    %89 = vector.load %arg10[%c0_38, %c0_39] : memref<1x32xf32, #tpu.memory_space<vmem>>, vector<1x32xf32>
    %cst_40 = arith.constant dense<0.000000e+00> : vector<8xf32>
    %90 = vector.multi_reduction <add>, %87, %cst_40 [1] : vector<8x32xf32> to vector<8xf32>
    %91 = vector.shape_cast %90 : vector<8xf32> to vector<8x1xf32>
    %cst_41 = arith.constant 3.200000e+01 : f32
    %92 = vector.broadcast %cst_41 : f32 to vector<8x1xf32>
    %93 = arith.divf %91, %92 : vector<8x1xf32>
    %94 = vector.broadcast %93 : vector<8x1xf32> to vector<8x32xf32>
    %95 = arith.subf %87, %94 : vector<8x32xf32>
    %96 = arith.mulf %95, %95 : vector<8x32xf32>
    %cst_42 = arith.constant dense<0.000000e+00> : vector<8xf32>
    %97 = vector.multi_reduction <add>, %96, %cst_42 [1] : vector<8x32xf32> to vector<8xf32>
    %98 = vector.shape_cast %97 : vector<8xf32> to vector<8x1xf32>
    %cst_43 = arith.constant 3.200000e+01 : f32
    %99 = vector.broadcast %cst_43 : f32 to vector<8x1xf32>
    %100 = arith.divf %98, %99 : vector<8x1xf32>
    %101 = vector.broadcast %93 : vector<8x1xf32> to vector<8x32xf32>
    %102 = arith.subf %87, %101 : vector<8x32xf32>
    %cst_44 = arith.constant 9.99999974E-6 : f32
    %103 = vector.broadcast %cst_44 : f32 to vector<8x1xf32>
    %104 = arith.addf %100, %103 : vector<8x1xf32>
    %105 = math.rsqrt %104 : vector<8x1xf32>
    %106 = vector.broadcast %105 : vector<8x1xf32> to vector<8x32xf32>
    %107 = arith.mulf %102, %106 : vector<8x32xf32>
    %108 = vector.broadcast %88 : vector<1x32xf32> to vector<8x32xf32>
    %109 = arith.mulf %107, %108 : vector<8x32xf32>
    %110 = vector.broadcast %89 : vector<1x32xf32> to vector<8x32xf32>
    %111 = arith.addf %109, %110 : vector<8x32xf32>
    %c0_45 = arith.constant 0 : index
    %c0_46 = arith.constant 0 : index
    %c0_47 = arith.constant 0 : index
    %112 = vector.load %arg11[%c0_45, %c0_46, %c0_47] : memref<1x8x32xf32, #tpu.memory_space<vmem>>, vector<1x8x32xf32>
    %113 = vector.shape_cast %112 : vector<1x8x32xf32> to vector<8x32xf32>
    %114 = vector.shape_cast %111 : vector<8x32xf32> to vector<1x8x32xf32>
    tpu.vector_store %arg11[%c0_45, %c0_46, %c0_47], %114 {strides = array<i32>} : memref<1x8x32xf32, #tpu.memory_space<vmem>>, vector<1x8x32xf32>,
    %cst_48 = arith.constant 2.500000e-01 : f32
    %115 = vector.broadcast %cst_48 : f32 to vector<8x8xf32>
    %116 = arith.mulf %79, %115 : vector<8x8xf32>
    %c0_49 = arith.constant 0 : index
    %c0_50 = arith.constant 0 : index
    %c0_51 = arith.constant 0 : index
    %117 = vector.load %arg12[%c0_49, %c0_50, %c0_51] : memref<1x8x8xf32, #tpu.memory_space<vmem>>, vector<1x8x8xf32>
    %118 = vector.shape_cast %117 : vector<1x8x8xf32> to vector<8x8xf32>
    %119 = vector.shape_cast %116 : vector<8x8xf32> to vector<1x8x8xf32>
    tpu.vector_store %arg12[%c0_49, %c0_50, %c0_51], %119 {strides = array<i32>} : memref<1x8x8xf32, #tpu.memory_space<vmem>>, vector<1x8x8xf32>,
    return
  }
  func.func @transform_0(%arg0: i32) -> (i32, i32, i32) {
    %c0_i32 = arith.constant 0 : i32
    %c0_i32_0 = arith.constant 0 : i32
    %c0_i32_1 = arith.constant 0 : i32
    return %arg0, %c0_i32, %c0_i32_0 : i32, i32, i32
  }
  func.func @transform_1(%arg0: i32) -> (i32, i32, i32) {
    %c0_i32 = arith.constant 0 : i32
    %c0_i32_0 = arith.constant 0 : i32
    %c0_i32_1 = arith.constant 0 : i32
    return %arg0, %c0_i32, %c0_i32_0 : i32, i32, i32
  }
  func.func @transform_2(%arg0: i32) -> (i32, i32) {
    %c0_i32 = arith.constant 0 : i32
    %c0_i32_0 = arith.constant 0 : i32
    %c0_i32_1 = arith.constant 0 : i32
    return %c0_i32, %c0_i32_0 : i32, i32
  }
  func.func @transform_3(%arg0: i32) -> (i32, i32) {
    %c0_i32 = arith.constant 0 : i32
    %c0_i32_0 = arith.constant 0 : i32
    %c0_i32_1 = arith.constant 0 : i32
    return %c0_i32, %c0_i32_0 : i32, i32
  }
  func.func @transform_4(%arg0: i32) -> (i32, i32) {
    %c0_i32 = arith.constant 0 : i32
    %c0_i32_0 = arith.constant 0 : i32
    %c0_i32_1 = arith.constant 0 : i32
    return %c0_i32, %c0_i32_0 : i32, i32
  }
  func.func @transform_5(%arg0: i32) -> (i32, i32) {
    %c0_i32 = arith.constant 0 : i32
    %c0_i32_0 = arith.constant 0 : i32
    %c0_i32_1 = arith.constant 0 : i32
    return %c0_i32, %c0_i32_0 : i32, i32
  }
  func.func @transform_6(%arg0: i32) -> (i32, i32) {
    %c0_i32 = arith.constant 0 : i32
    %c0_i32_0 = arith.constant 0 : i32
    %c0_i32_1 = arith.constant 0 : i32
    return %c0_i32, %c0_i32_0 : i32, i32
  }
  func.func @transform_7(%arg0: i32) -> (i32, i32) {
    %c0_i32 = arith.constant 0 : i32
    %c0_i32_0 = arith.constant 0 : i32
    %c0_i32_1 = arith.constant 0 : i32
    return %c0_i32, %c0_i32_0 : i32, i32
  }
  func.func @transform_8(%arg0: i32) -> (i32, i32) {
    %c0_i32 = arith.constant 0 : i32
    %c0_i32_0 = arith.constant 0 : i32
    %c0_i32_1 = arith.constant 0 : i32
    return %c0_i32, %c0_i32_0 : i32, i32
  }
  func.func @transform_9(%arg0: i32) -> (i32, i32) {
    %c0_i32 = arith.constant 0 : i32
    %c0_i32_0 = arith.constant 0 : i32
    %c0_i32_1 = arith.constant 0 : i32
    return %c0_i32, %c0_i32_0 : i32, i32
  }
  func.func @transform_10(%arg0: i32) -> (i32, i32, i32) {
    %c0_i32 = arith.constant 0 : i32
    %c0_i32_0 = arith.constant 0 : i32
    %c0_i32_1 = arith.constant 0 : i32
    return %arg0, %c0_i32, %c0_i32_0 : i32, i32, i32
  }
  func.func @transform_11(%arg0: i32) -> (i32, i32, i32) {
    %c0_i32 = arith.constant 0 : i32
    %c0_i32_0 = arith.constant 0 : i32
    %c0_i32_1 = arith.constant 0 : i32
    return %arg0, %c0_i32, %c0_i32_0 : i32, i32, i32
  }
}

module attributes {stable_mosaic.version = 11 : i64} {
  func.func @_self_attn_block_kernel(%arg0: i32, %arg1: memref<1x8x32xf32, #tpu.memory_space<vmem>>, %arg2: memref<32x96xf32, #tpu.memory_space<vmem>>, %arg3: memref<1x96xf32, #tpu.memory_space<vmem>>, %arg4: memref<32x32xf32, #tpu.memory_space<vmem>>, %arg5: memref<1x32xf32, #tpu.memory_space<vmem>>, %arg6: memref<1x32xf32, #tpu.memory_space<vmem>>, %arg7: memref<1x32xf32, #tpu.memory_space<vmem>>, %arg8: memref<1x8x32xf32, #tpu.memory_space<vmem>>) attributes {dimension_semantics = [#tpu.dimension_semantics<parallel>], iteration_bounds = array<i64: 2>, scalar_prefetch = 0 : i64, scratch_operands = 0 : i64, tpu.core_type = #tpu.core_type<tc>, window_params = [{transform_indices = @transform_0, window_bounds = array<i64: 1, 8, 32>}, {pipeline_mode = #tpu.pipeline_mode<synchronous>, transform_indices = @transform_1, window_bounds = array<i64: 32, 96>}, {pipeline_mode = #tpu.pipeline_mode<synchronous>, transform_indices = @transform_2, window_bounds = array<i64: 1, 96>}, {pipeline_mode = #tpu.pipeline_mode<synchronous>, transform_indices = @transform_3, window_bounds = array<i64: 32, 32>}, {pipeline_mode = #tpu.pipeline_mode<synchronous>, transform_indices = @transform_4, window_bounds = array<i64: 1, 32>}, {pipeline_mode = #tpu.pipeline_mode<synchronous>, transform_indices = @transform_5, window_bounds = array<i64: 1, 32>}, {pipeline_mode = #tpu.pipeline_mode<synchronous>, transform_indices = @transform_6, window_bounds = array<i64: 1, 32>}, {transform_indices = @transform_7, window_bounds = array<i64: 1, 8, 32>}]} {
    %c0 = arith.constant 0 : index
    %c0_0 = arith.constant 0 : index
    %c0_1 = arith.constant 0 : index
    %0 = vector.load %arg1[%c0, %c0_0, %c0_1] : memref<1x8x32xf32, #tpu.memory_space<vmem>>, vector<1x8x32xf32>
    %1 = vector.shape_cast %0 : vector<1x8x32xf32> to vector<8x32xf32>
    %c0_2 = arith.constant 0 : index
    %c0_3 = arith.constant 0 : index
    %2 = vector.load %arg2[%c0_2, %c0_3] : memref<32x96xf32, #tpu.memory_space<vmem>>, vector<32x96xf32>
    %cst = arith.constant dense<0.000000e+00> : vector<8x96xf32>
    %3 = tpu.matmul %1, %2, %cst {dimension_numbers = #tpu.dot_dimension_numbers<[1], [0], [0], [1], [0, 0, 1, 1], [], []>} : vector<8x32xf32>, vector<32x96xf32>, vector<8x96xf32> -> vector<8x96xf32>
    %c0_4 = arith.constant 0 : index
    %c0_5 = arith.constant 0 : index
    %4 = vector.load %arg3[%c0_4, %c0_5] : memref<1x96xf32, #tpu.memory_space<vmem>>, vector<1x96xf32>
    %5 = vector.broadcast %4 : vector<1x96xf32> to vector<8x96xf32>
    %6 = arith.addf %3, %5 : vector<8x96xf32>
    %7 = vector.extract_strided_slice %6 {offsets = [0, 0], sizes = [8, 32], strides = [1, 1]} : vector<8x96xf32> to vector<8x32xf32>
    %cst_6 = arith.constant 0.353553385 : f32
    %8 = vector.broadcast %cst_6 : f32 to vector<8x32xf32>
    %9 = arith.mulf %7, %8 : vector<8x32xf32>
    %10 = vector.extract_strided_slice %6 {offsets = [0, 32], sizes = [8, 32], strides = [1, 1]} : vector<8x96xf32> to vector<8x32xf32>
    %11 = vector.extract_strided_slice %6 {offsets = [0, 64], sizes = [8, 32], strides = [1, 1]} : vector<8x96xf32> to vector<8x32xf32>
    %12 = vector.extract_strided_slice %9 {offsets = [0, 0], sizes = [8, 8], strides = [1, 1]} : vector<8x32xf32> to vector<8x8xf32>
    %13 = vector.extract_strided_slice %10 {offsets = [0, 0], sizes = [8, 8], strides = [1, 1]} : vector<8x32xf32> to vector<8x8xf32>
    %14 = vector.extract_strided_slice %11 {offsets = [0, 0], sizes = [8, 8], strides = [1, 1]} : vector<8x32xf32> to vector<8x8xf32>
    %cst_7 = arith.constant dense<0.000000e+00> : vector<8x8xf32>
    %15 = tpu.matmul %12, %13, %cst_7 {dimension_numbers = #tpu.dot_dimension_numbers<[1], [1], [0], [0], [0, 0, 1, 0], [], []>} : vector<8x8xf32>, vector<8x8xf32>, vector<8x8xf32> -> vector<8x8xf32>
    %cst_8 = arith.constant dense<0xFF800000> : vector<8xf32>
    %16 = vector.multi_reduction <maximumf>, %15, %cst_8 [1] : vector<8x8xf32> to vector<8xf32>
    %17 = vector.shape_cast %16 : vector<8xf32> to vector<8x1xf32>
    %18 = vector.broadcast %17 : vector<8x1xf32> to vector<8x8xf32>
    %19 = arith.subf %15, %18 : vector<8x8xf32>
    %20 = math.exp %19 : vector<8x8xf32>
    %cst_9 = arith.constant dense<0.000000e+00> : vector<8xf32>
    %21 = vector.multi_reduction <add>, %20, %cst_9 [1] : vector<8x8xf32> to vector<8xf32>
    %22 = vector.shape_cast %21 : vector<8xf32> to vector<8x1xf32>
    %23 = tpu.reciprocal %22 {approx = true} : vector<8x1xf32> -> vector<8x1xf32>
    %24 = vector.broadcast %23 : vector<8x1xf32> to vector<8x8xf32>
    %25 = arith.mulf %20, %24 : vector<8x8xf32>
    %cst_10 = arith.constant dense<0.000000e+00> : vector<8x8xf32>
    %26 = tpu.matmul %25, %14, %cst_10 {dimension_numbers = #tpu.dot_dimension_numbers<[1], [0], [0], [1], [0, 0, 1, 1], [], []>} : vector<8x8xf32>, vector<8x8xf32>, vector<8x8xf32> -> vector<8x8xf32>
    %27 = vector.extract_strided_slice %9 {offsets = [0, 8], sizes = [8, 8], strides = [1, 1]} : vector<8x32xf32> to vector<8x8xf32>
    %28 = vector.extract_strided_slice %10 {offsets = [0, 8], sizes = [8, 8], strides = [1, 1]} : vector<8x32xf32> to vector<8x8xf32>
    %29 = vector.extract_strided_slice %11 {offsets = [0, 8], sizes = [8, 8], strides = [1, 1]} : vector<8x32xf32> to vector<8x8xf32>
    %cst_11 = arith.constant dense<0.000000e+00> : vector<8x8xf32>
    %30 = tpu.matmul %27, %28, %cst_11 {dimension_numbers = #tpu.dot_dimension_numbers<[1], [1], [0], [0], [0, 0, 1, 0], [], []>} : vector<8x8xf32>, vector<8x8xf32>, vector<8x8xf32> -> vector<8x8xf32>
    %cst_12 = arith.constant dense<0xFF800000> : vector<8xf32>
    %31 = vector.multi_reduction <maximumf>, %30, %cst_12 [1] : vector<8x8xf32> to vector<8xf32>
    %32 = vector.shape_cast %31 : vector<8xf32> to vector<8x1xf32>
    %33 = vector.broadcast %32 : vector<8x1xf32> to vector<8x8xf32>
    %34 = arith.subf %30, %33 : vector<8x8xf32>
    %35 = math.exp %34 : vector<8x8xf32>
    %cst_13 = arith.constant dense<0.000000e+00> : vector<8xf32>
    %36 = vector.multi_reduction <add>, %35, %cst_13 [1] : vector<8x8xf32> to vector<8xf32>
    %37 = vector.shape_cast %36 : vector<8xf32> to vector<8x1xf32>
    %38 = tpu.reciprocal %37 {approx = true} : vector<8x1xf32> -> vector<8x1xf32>
    %39 = vector.broadcast %38 : vector<8x1xf32> to vector<8x8xf32>
    %40 = arith.mulf %35, %39 : vector<8x8xf32>
    %cst_14 = arith.constant dense<0.000000e+00> : vector<8x8xf32>
    %41 = tpu.matmul %40, %29, %cst_14 {dimension_numbers = #tpu.dot_dimension_numbers<[1], [0], [0], [1], [0, 0, 1, 1], [], []>} : vector<8x8xf32>, vector<8x8xf32>, vector<8x8xf32> -> vector<8x8xf32>
    %42 = vector.extract_strided_slice %9 {offsets = [0, 16], sizes = [8, 8], strides = [1, 1]} : vector<8x32xf32> to vector<8x8xf32>
    %43 = vector.extract_strided_slice %10 {offsets = [0, 16], sizes = [8, 8], strides = [1, 1]} : vector<8x32xf32> to vector<8x8xf32>
    %44 = vector.extract_strided_slice %11 {offsets = [0, 16], sizes = [8, 8], strides = [1, 1]} : vector<8x32xf32> to vector<8x8xf32>
    %cst_15 = arith.constant dense<0.000000e+00> : vector<8x8xf32>
    %45 = tpu.matmul %42, %43, %cst_15 {dimension_numbers = #tpu.dot_dimension_numbers<[1], [1], [0], [0], [0, 0, 1, 0], [], []>} : vector<8x8xf32>, vector<8x8xf32>, vector<8x8xf32> -> vector<8x8xf32>
    %cst_16 = arith.constant dense<0xFF800000> : vector<8xf32>
    %46 = vector.multi_reduction <maximumf>, %45, %cst_16 [1] : vector<8x8xf32> to vector<8xf32>
    %47 = vector.shape_cast %46 : vector<8xf32> to vector<8x1xf32>
    %48 = vector.broadcast %47 : vector<8x1xf32> to vector<8x8xf32>
    %49 = arith.subf %45, %48 : vector<8x8xf32>
    %50 = math.exp %49 : vector<8x8xf32>
    %cst_17 = arith.constant dense<0.000000e+00> : vector<8xf32>
    %51 = vector.multi_reduction <add>, %50, %cst_17 [1] : vector<8x8xf32> to vector<8xf32>
    %52 = vector.shape_cast %51 : vector<8xf32> to vector<8x1xf32>
    %53 = tpu.reciprocal %52 {approx = true} : vector<8x1xf32> -> vector<8x1xf32>
    %54 = vector.broadcast %53 : vector<8x1xf32> to vector<8x8xf32>
    %55 = arith.mulf %50, %54 : vector<8x8xf32>
    %cst_18 = arith.constant dense<0.000000e+00> : vector<8x8xf32>
    %56 = tpu.matmul %55, %44, %cst_18 {dimension_numbers = #tpu.dot_dimension_numbers<[1], [0], [0], [1], [0, 0, 1, 1], [], []>} : vector<8x8xf32>, vector<8x8xf32>, vector<8x8xf32> -> vector<8x8xf32>
    %57 = vector.extract_strided_slice %9 {offsets = [0, 24], sizes = [8, 8], strides = [1, 1]} : vector<8x32xf32> to vector<8x8xf32>
    %58 = vector.extract_strided_slice %10 {offsets = [0, 24], sizes = [8, 8], strides = [1, 1]} : vector<8x32xf32> to vector<8x8xf32>
    %59 = vector.extract_strided_slice %11 {offsets = [0, 24], sizes = [8, 8], strides = [1, 1]} : vector<8x32xf32> to vector<8x8xf32>
    %cst_19 = arith.constant dense<0.000000e+00> : vector<8x8xf32>
    %60 = tpu.matmul %57, %58, %cst_19 {dimension_numbers = #tpu.dot_dimension_numbers<[1], [1], [0], [0], [0, 0, 1, 0], [], []>} : vector<8x8xf32>, vector<8x8xf32>, vector<8x8xf32> -> vector<8x8xf32>
    %cst_20 = arith.constant dense<0xFF800000> : vector<8xf32>
    %61 = vector.multi_reduction <maximumf>, %60, %cst_20 [1] : vector<8x8xf32> to vector<8xf32>
    %62 = vector.shape_cast %61 : vector<8xf32> to vector<8x1xf32>
    %63 = vector.broadcast %62 : vector<8x1xf32> to vector<8x8xf32>
    %64 = arith.subf %60, %63 : vector<8x8xf32>
    %65 = math.exp %64 : vector<8x8xf32>
    %cst_21 = arith.constant dense<0.000000e+00> : vector<8xf32>
    %66 = vector.multi_reduction <add>, %65, %cst_21 [1] : vector<8x8xf32> to vector<8xf32>
    %67 = vector.shape_cast %66 : vector<8xf32> to vector<8x1xf32>
    %68 = tpu.reciprocal %67 {approx = true} : vector<8x1xf32> -> vector<8x1xf32>
    %69 = vector.broadcast %68 : vector<8x1xf32> to vector<8x8xf32>
    %70 = arith.mulf %65, %69 : vector<8x8xf32>
    %cst_22 = arith.constant dense<0.000000e+00> : vector<8x8xf32>
    %71 = tpu.matmul %70, %59, %cst_22 {dimension_numbers = #tpu.dot_dimension_numbers<[1], [0], [0], [1], [0, 0, 1, 1], [], []>} : vector<8x8xf32>, vector<8x8xf32>, vector<8x8xf32> -> vector<8x8xf32>
    %72 = tpu.concatenate %26, %41, %56, %71 in 1 : vector<8x8xf32>, vector<8x8xf32>, vector<8x8xf32>, vector<8x8xf32> -> vector<8x32xf32>
    %c0_23 = arith.constant 0 : index
    %c0_24 = arith.constant 0 : index
    %73 = vector.load %arg4[%c0_23, %c0_24] : memref<32x32xf32, #tpu.memory_space<vmem>>, vector<32x32xf32>
    %cst_25 = arith.constant dense<0.000000e+00> : vector<8x32xf32>
    %74 = tpu.matmul %72, %73, %cst_25 {dimension_numbers = #tpu.dot_dimension_numbers<[1], [0], [0], [1], [0, 0, 1, 1], [], []>} : vector<8x32xf32>, vector<32x32xf32>, vector<8x32xf32> -> vector<8x32xf32>
    %c0_26 = arith.constant 0 : index
    %c0_27 = arith.constant 0 : index
    %75 = vector.load %arg5[%c0_26, %c0_27] : memref<1x32xf32, #tpu.memory_space<vmem>>, vector<1x32xf32>
    %76 = vector.broadcast %75 : vector<1x32xf32> to vector<8x32xf32>
    %77 = arith.addf %74, %76 : vector<8x32xf32>
    %78 = arith.addf %77, %1 : vector<8x32xf32>
    %c0_28 = arith.constant 0 : index
    %c0_29 = arith.constant 0 : index
    %79 = vector.load %arg6[%c0_28, %c0_29] : memref<1x32xf32, #tpu.memory_space<vmem>>, vector<1x32xf32>
    %c0_30 = arith.constant 0 : index
    %c0_31 = arith.constant 0 : index
    %80 = vector.load %arg7[%c0_30, %c0_31] : memref<1x32xf32, #tpu.memory_space<vmem>>, vector<1x32xf32>
    %cst_32 = arith.constant dense<0.000000e+00> : vector<8xf32>
    %81 = vector.multi_reduction <add>, %78, %cst_32 [1] : vector<8x32xf32> to vector<8xf32>
    %82 = vector.shape_cast %81 : vector<8xf32> to vector<8x1xf32>
    %cst_33 = arith.constant 3.200000e+01 : f32
    %83 = vector.broadcast %cst_33 : f32 to vector<8x1xf32>
    %84 = arith.divf %82, %83 : vector<8x1xf32>
    %85 = vector.broadcast %84 : vector<8x1xf32> to vector<8x32xf32>
    %86 = arith.subf %78, %85 : vector<8x32xf32>
    %87 = arith.mulf %86, %86 : vector<8x32xf32>
    %cst_34 = arith.constant dense<0.000000e+00> : vector<8xf32>
    %88 = vector.multi_reduction <add>, %87, %cst_34 [1] : vector<8x32xf32> to vector<8xf32>
    %89 = vector.shape_cast %88 : vector<8xf32> to vector<8x1xf32>
    %cst_35 = arith.constant 3.200000e+01 : f32
    %90 = vector.broadcast %cst_35 : f32 to vector<8x1xf32>
    %91 = arith.divf %89, %90 : vector<8x1xf32>
    %92 = vector.broadcast %84 : vector<8x1xf32> to vector<8x32xf32>
    %93 = arith.subf %78, %92 : vector<8x32xf32>
    %cst_36 = arith.constant 9.99999974E-6 : f32
    %94 = vector.broadcast %cst_36 : f32 to vector<8x1xf32>
    %95 = arith.addf %91, %94 : vector<8x1xf32>
    %96 = math.rsqrt %95 : vector<8x1xf32>
    %97 = vector.broadcast %96 : vector<8x1xf32> to vector<8x32xf32>
    %98 = arith.mulf %93, %97 : vector<8x32xf32>
    %99 = vector.broadcast %79 : vector<1x32xf32> to vector<8x32xf32>
    %100 = arith.mulf %98, %99 : vector<8x32xf32>
    %101 = vector.broadcast %80 : vector<1x32xf32> to vector<8x32xf32>
    %102 = arith.addf %100, %101 : vector<8x32xf32>
    %c0_37 = arith.constant 0 : index
    %c0_38 = arith.constant 0 : index
    %c0_39 = arith.constant 0 : index
    %103 = vector.load %arg8[%c0_37, %c0_38, %c0_39] : memref<1x8x32xf32, #tpu.memory_space<vmem>>, vector<1x8x32xf32>
    %104 = vector.shape_cast %103 : vector<1x8x32xf32> to vector<8x32xf32>
    %105 = vector.shape_cast %102 : vector<8x32xf32> to vector<1x8x32xf32>
    tpu.vector_store %arg8[%c0_37, %c0_38, %c0_39], %105 {strides = array<i32>} : memref<1x8x32xf32, #tpu.memory_space<vmem>>, vector<1x8x32xf32>,
    return
  }
  func.func @transform_0(%arg0: i32) -> (i32, i32, i32) {
    %c0_i32 = arith.constant 0 : i32
    %c0_i32_0 = arith.constant 0 : i32
    %c0_i32_1 = arith.constant 0 : i32
    return %arg0, %c0_i32, %c0_i32_0 : i32, i32, i32
  }
  func.func @transform_1(%arg0: i32) -> (i32, i32) {
    %c0_i32 = arith.constant 0 : i32
    %c0_i32_0 = arith.constant 0 : i32
    %c0_i32_1 = arith.constant 0 : i32
    return %c0_i32, %c0_i32_0 : i32, i32
  }
  func.func @transform_2(%arg0: i32) -> (i32, i32) {
    %c0_i32 = arith.constant 0 : i32
    %c0_i32_0 = arith.constant 0 : i32
    %c0_i32_1 = arith.constant 0 : i32
    return %c0_i32, %c0_i32_0 : i32, i32
  }
  func.func @transform_3(%arg0: i32) -> (i32, i32) {
    %c0_i32 = arith.constant 0 : i32
    %c0_i32_0 = arith.constant 0 : i32
    %c0_i32_1 = arith.constant 0 : i32
    return %c0_i32, %c0_i32_0 : i32, i32
  }
  func.func @transform_4(%arg0: i32) -> (i32, i32) {
    %c0_i32 = arith.constant 0 : i32
    %c0_i32_0 = arith.constant 0 : i32
    %c0_i32_1 = arith.constant 0 : i32
    return %c0_i32, %c0_i32_0 : i32, i32
  }
  func.func @transform_5(%arg0: i32) -> (i32, i32) {
    %c0_i32 = arith.constant 0 : i32
    %c0_i32_0 = arith.constant 0 : i32
    %c0_i32_1 = arith.constant 0 : i32
    return %c0_i32, %c0_i32_0 : i32, i32
  }
  func.func @transform_6(%arg0: i32) -> (i32, i32) {
    %c0_i32 = arith.constant 0 : i32
    %c0_i32_0 = arith.constant 0 : i32
    %c0_i32_1 = arith.constant 0 : i32
    return %c0_i32, %c0_i32_0 : i32, i32
  }
  func.func @transform_7(%arg0: i32) -> (i32, i32, i32) {
    %c0_i32 = arith.constant 0 : i32
    %c0_i32_0 = arith.constant 0 : i32
    %c0_i32_1 = arith.constant 0 : i32
    return %arg0, %c0_i32, %c0_i32_0 : i32, i32, i32
  }
}

module attributes {stable_mosaic.version = 11 : i64} {
  func.func @_ffn_block_kernel(%arg0: i32, %arg1: memref<16x32xf32, #tpu.memory_space<vmem>>, %arg2: memref<32x64xf32, #tpu.memory_space<vmem>>, %arg3: memref<1x64xf32, #tpu.memory_space<vmem>>, %arg4: memref<64x32xf32, #tpu.memory_space<vmem>>, %arg5: memref<1x32xf32, #tpu.memory_space<vmem>>, %arg6: memref<1x32xf32, #tpu.memory_space<vmem>>, %arg7: memref<1x32xf32, #tpu.memory_space<vmem>>, %arg8: memref<16x32xf32, #tpu.memory_space<vmem>>) attributes {dimension_semantics = [#tpu.dimension_semantics<parallel>], iteration_bounds = array<i64: 1>, scalar_prefetch = 0 : i64, scratch_operands = 0 : i64, tpu.core_type = #tpu.core_type<tc>, window_params = [{transform_indices = @transform_0, window_bounds = array<i64: 16, 32>}, {pipeline_mode = #tpu.pipeline_mode<synchronous>, transform_indices = @transform_1, window_bounds = array<i64: 32, 64>}, {pipeline_mode = #tpu.pipeline_mode<synchronous>, transform_indices = @transform_2, window_bounds = array<i64: 1, 64>}, {pipeline_mode = #tpu.pipeline_mode<synchronous>, transform_indices = @transform_3, window_bounds = array<i64: 64, 32>}, {pipeline_mode = #tpu.pipeline_mode<synchronous>, transform_indices = @transform_4, window_bounds = array<i64: 1, 32>}, {pipeline_mode = #tpu.pipeline_mode<synchronous>, transform_indices = @transform_5, window_bounds = array<i64: 1, 32>}, {pipeline_mode = #tpu.pipeline_mode<synchronous>, transform_indices = @transform_6, window_bounds = array<i64: 1, 32>}, {transform_indices = @transform_7, window_bounds = array<i64: 16, 32>}]} {
    %c0 = arith.constant 0 : index
    %c0_0 = arith.constant 0 : index
    %0 = vector.load %arg1[%c0, %c0_0] : memref<16x32xf32, #tpu.memory_space<vmem>>, vector<16x32xf32>
    %c0_1 = arith.constant 0 : index
    %c0_2 = arith.constant 0 : index
    %1 = vector.load %arg2[%c0_1, %c0_2] : memref<32x64xf32, #tpu.memory_space<vmem>>, vector<32x64xf32>
    %cst = arith.constant dense<0.000000e+00> : vector<16x64xf32>
    %2 = tpu.matmul %0, %1, %cst {dimension_numbers = #tpu.dot_dimension_numbers<[1], [0], [0], [1], [0, 0, 1, 1], [], []>} : vector<16x32xf32>, vector<32x64xf32>, vector<16x64xf32> -> vector<16x64xf32>
    %c0_3 = arith.constant 0 : index
    %c0_4 = arith.constant 0 : index
    %3 = vector.load %arg3[%c0_3, %c0_4] : memref<1x64xf32, #tpu.memory_space<vmem>>, vector<1x64xf32>
    %4 = vector.broadcast %3 : vector<1x64xf32> to vector<16x64xf32>
    %5 = arith.addf %2, %4 : vector<16x64xf32>
    %cst_5 = arith.constant 0.000000e+00 : f32
    %6 = vector.broadcast %cst_5 : f32 to vector<16x64xf32>
    %7 = arith.maximumf %5, %6 : vector<16x64xf32>
    %c0_6 = arith.constant 0 : index
    %c0_7 = arith.constant 0 : index
    %8 = vector.load %arg4[%c0_6, %c0_7] : memref<64x32xf32, #tpu.memory_space<vmem>>, vector<64x32xf32>
    %cst_8 = arith.constant dense<0.000000e+00> : vector<16x32xf32>
    %9 = tpu.matmul %7, %8, %cst_8 {dimension_numbers = #tpu.dot_dimension_numbers<[1], [0], [0], [1], [0, 0, 1, 1], [], []>} : vector<16x64xf32>, vector<64x32xf32>, vector<16x32xf32> -> vector<16x32xf32>
    %c0_9 = arith.constant 0 : index
    %c0_10 = arith.constant 0 : index
    %10 = vector.load %arg5[%c0_9, %c0_10] : memref<1x32xf32, #tpu.memory_space<vmem>>, vector<1x32xf32>
    %11 = vector.broadcast %10 : vector<1x32xf32> to vector<16x32xf32>
    %12 = arith.addf %9, %11 : vector<16x32xf32>
    %13 = arith.addf %12, %0 : vector<16x32xf32>
    %c0_11 = arith.constant 0 : index
    %c0_12 = arith.constant 0 : index
    %14 = vector.load %arg6[%c0_11, %c0_12] : memref<1x32xf32, #tpu.memory_space<vmem>>, vector<1x32xf32>
    %c0_13 = arith.constant 0 : index
    %c0_14 = arith.constant 0 : index
    %15 = vector.load %arg7[%c0_13, %c0_14] : memref<1x32xf32, #tpu.memory_space<vmem>>, vector<1x32xf32>
    %cst_15 = arith.constant dense<0.000000e+00> : vector<16xf32>
    %16 = vector.multi_reduction <add>, %13, %cst_15 [1] : vector<16x32xf32> to vector<16xf32>
    %17 = vector.shape_cast %16 : vector<16xf32> to vector<16x1xf32>
    %cst_16 = arith.constant 3.200000e+01 : f32
    %18 = vector.broadcast %cst_16 : f32 to vector<16x1xf32>
    %19 = arith.divf %17, %18 : vector<16x1xf32>
    %20 = vector.broadcast %19 : vector<16x1xf32> to vector<16x32xf32>
    %21 = arith.subf %13, %20 : vector<16x32xf32>
    %22 = arith.mulf %21, %21 : vector<16x32xf32>
    %cst_17 = arith.constant dense<0.000000e+00> : vector<16xf32>
    %23 = vector.multi_reduction <add>, %22, %cst_17 [1] : vector<16x32xf32> to vector<16xf32>
    %24 = vector.shape_cast %23 : vector<16xf32> to vector<16x1xf32>
    %cst_18 = arith.constant 3.200000e+01 : f32
    %25 = vector.broadcast %cst_18 : f32 to vector<16x1xf32>
    %26 = arith.divf %24, %25 : vector<16x1xf32>
    %27 = vector.broadcast %19 : vector<16x1xf32> to vector<16x32xf32>
    %28 = arith.subf %13, %27 : vector<16x32xf32>
    %cst_19 = arith.constant 9.99999974E-6 : f32
    %29 = vector.broadcast %cst_19 : f32 to vector<16x1xf32>
    %30 = arith.addf %26, %29 : vector<16x1xf32>
    %31 = math.rsqrt %30 : vector<16x1xf32>
    %32 = vector.broadcast %31 : vector<16x1xf32> to vector<16x32xf32>
    %33 = arith.mulf %28, %32 : vector<16x32xf32>
    %34 = vector.broadcast %14 : vector<1x32xf32> to vector<16x32xf32>
    %35 = arith.mulf %33, %34 : vector<16x32xf32>
    %36 = vector.broadcast %15 : vector<1x32xf32> to vector<16x32xf32>
    %37 = arith.addf %35, %36 : vector<16x32xf32>
    %c0_20 = arith.constant 0 : index
    %c0_21 = arith.constant 0 : index
    %38 = vector.load %arg8[%c0_20, %c0_21] : memref<16x32xf32, #tpu.memory_space<vmem>>, vector<16x32xf32>
    tpu.vector_store %arg8[%c0_20, %c0_21], %37 {strides = array<i32>} : memref<16x32xf32, #tpu.memory_space<vmem>>, vector<16x32xf32>,
    return
  }
  func.func @transform_0(%arg0: i32) -> (i32, i32) {
    %c0_i32 = arith.constant 0 : i32
    %c0_i32_0 = arith.constant 0 : i32
    return %arg0, %c0_i32 : i32, i32
  }
  func.func @transform_1(%arg0: i32) -> (i32, i32) {
    %c0_i32 = arith.constant 0 : i32
    %c0_i32_0 = arith.constant 0 : i32
    %c0_i32_1 = arith.constant 0 : i32
    return %c0_i32, %c0_i32_0 : i32, i32
  }
  func.func @transform_2(%arg0: i32) -> (i32, i32) {
    %c0_i32 = arith.constant 0 : i32
    %c0_i32_0 = arith.constant 0 : i32
    %c0_i32_1 = arith.constant 0 : i32
    return %c0_i32, %c0_i32_0 : i32, i32
  }
  func.func @transform_3(%arg0: i32) -> (i32, i32) {
    %c0_i32 = arith.constant 0 : i32
    %c0_i32_0 = arith.constant 0 : i32
    %c0_i32_1 = arith.constant 0 : i32
    return %c0_i32, %c0_i32_0 : i32, i32
  }
  func.func @transform_4(%arg0: i32) -> (i32, i32) {
    %c0_i32 = arith.constant 0 : i32
    %c0_i32_0 = arith.constant 0 : i32
    %c0_i32_1 = arith.constant 0 : i32
    return %c0_i32, %c0_i32_0 : i32, i32
  }
  func.func @transform_5(%arg0: i32) -> (i32, i32) {
    %c0_i32 = arith.constant 0 : i32
    %c0_i32_0 = arith.constant 0 : i32
    %c0_i32_1 = arith.constant 0 : i32
    return %c0_i32, %c0_i32_0 : i32, i32
  }
  func.func @transform_6(%arg0: i32) -> (i32, i32) {
    %c0_i32 = arith.constant 0 : i32
    %c0_i32_0 = arith.constant 0 : i32
    %c0_i32_1 = arith.constant 0 : i32
    return %c0_i32, %c0_i32_0 : i32, i32
  }
  func.func @transform_7(%arg0: i32) -> (i32, i32) {
    %c0_i32 = arith.constant 0 : i32
    %c0_i32_0 = arith.constant 0 : i32
    return %arg0, %c0_i32 : i32, i32
  }
}

</mosaic_0001>

<bundles_post_ra>
// kernel: transformer_decoder_layer_forward.5
= control target key start
LH: loop header
LB: loop body
LE: loop exit
PB: predicated region body
PF: predicated region fallthrough
CT: control target
= control target key end

     0   :  { %vm39_vm0 = vcmask 261120   ;;  %vm138_vm1 = vcmask 523264   ;;  %s463_s1 = inlined_call_operand.vmem [shape: f32[32,64], index: 1, kind: input, shape index: {}]   ;;  %s464_s0 = inlined_call_operand.vmem [shape: f32[16,32], index: 0, kind: input, shape index: {}]   ;;  %s465_s3 = inlined_call_operand.vmem [shape: f32[64,32], index: 3, kind: input, shape index: {}]   ;;  %s466_s2 = inlined_call_operand.vmem [shape: f32[1,64], index: 2, kind: input, shape index: {}]   ;;  %s467_s4 = inlined_call_operand.vmem [shape: f32[1,32], index: 4, kind: input, shape index: {}]   ;;  %s468_s5 = inlined_call_operand.vmem [shape: f32[1,32], index: 5, kind: input, shape index: {}]   ;;  %s469_s6 = inlined_call_operand.vmem [shape: f32[1,32], index: 6, kind: input, shape index: {}]   ;;  %s470_s7 = inlined_call_operand.vmem [shape: f32[16,32], index: 7, kind: output, shape index: {}]  }
   0x1   :  { %v28_v0 = vld [vmem:[%s463_s1] sm:$0xff]  ;;  %v29_v1 = vld [vmem:[%s463_s1 + $0x8] sm:$0xff]  ;;  %v30_v2 = vld [vmem:[%s463_s1 + $0x10] sm:$0xff] }
   0x2   :  { %v327_v3 = vpack.c.bf16 %v29_v1, %v28_v0  ;;  %v31_v4 = vld [vmem:[%s463_s1 + $0x18] sm:$0xff]  ;;  %v26_v5 = vld [vmem:[%s464_s0] sm:$0xff]  ;;  %v124_v8 = vld [vmem:[%s465_s3 + $0x8] sm:$0xff] }
   0x3   :  { %v331_v6 = vpack.c.bf16 %v31_v4, %v30_v2  ;;  %305 = vmatprep.mubr.msk.f32.mxu0 %vm39_vm0, %v26_v5  ;;  %v123_v7 = vld [vmem:[%s465_s3] sm:$0xff]  ;;  %v125_v9 = vld [vmem:[%s465_s3 + $0x10] sm:$0xff]  ;;  %v126_v11 = vld [vmem:[%s465_s3 + $0x18] sm:$0xff] }
   0x4   :  { %328 = vmatprep.subr.bf16.mxu0 %v327_v3  ;;  %v335_v10 = vpack.c.bf16 %v124_v8, %v123_v7  ;;  %v339_v12 = vpack.c.bf16 %v126_v11, %v125_v9  ;;  %v127_v13 = vld [vmem:[%s465_s3 + $0x20] sm:$0xff]  ;;  %v128_v14 = vld [vmem:[%s465_s3 + $0x28] sm:$0xff]  ;;  %v129_v17 = vld [vmem:[%s465_s3 + $0x30] sm:$0xff] }
   0x5   :  { %330 = vmatpush3.bf16.msra.mxu0 %v327_v3  ;;  %v343_v15 = vpack.c.bf16 %v128_v14, %v127_v13  ;;  %v27_v16 = vld [vmem:[%s464_s0 + $0x8] sm:$0xff]  ;;  %v130_v18 = vld [vmem:[%s465_s3 + $0x38] sm:$0xff]  ;;  %v273_v20 = vld [vmem:[%s466_s2] ss:$0 sm:$0xff] }
   0x6   :  { %332 = vmatprep.subr.bf16.mxu0 %v331_v6  ;;  %336 = vmatprep.subr.bf16.mxu1 %v335_v10  ;;  %v347_v19 = vpack.c.bf16 %v130_v18, %v129_v17  ;;  %v276_v27 = vld [vmem:[%s467_s4] ss:$0 sm:$0xff] }
   0x7   :  { %338 = vmatpush3.bf16.msra.mxu1 %v335_v10  ;;  %v279_v53 = vld [vmem:[%s468_s5] ss:$0 sm:$0xff] }
   0x8   :  { %340 = vmatprep.subr.bf16.mxu1 %v339_v12  ;;  %v280_v55 = vld [vmem:[%s469_s6] ss:$0 sm:$0xff] }
   0x9   :  { %334 = vmatpush3.bf16.msra.mxu0 %v331_v6 }
   0xb   :  { %342 = vmatpush3.bf16.msra.mxu1 %v339_v12 }
   0xc   :  { %306 = vmatmul.mubr.msk.f32.vlgmr.msra.gmra.mrb[0].mxu0 %vm39_vm0, %v27_v16  ;;  %344 = vmatprep.subr.bf16.mxu1 %v343_v15 }
   0xf   :  { %346 = vmatpush3.bf16.msra.mxu1 %v343_v15 }
  0x10   :  { %348 = vmatprep.subr.bf16.mxu1 %v347_v19 }
  0x13   :  { %350 = vmatpush3.bf16.msra.mxu1 %v347_v19 }
  0xdf   :  { %v307_v21 = vpop.f32.mrb[0].mxu0 }
  0xe0   :  { %v118_v22 = vadd.f32 %v307_v21, %v273_v20  ;;  %v112_v23 = vpop.f32.mrb[1].mxu0 }
  0xe1   :  { %v113_v24 = vadd.f32 %v273_v20, %v112_v23 }
  0xe2   :  { %v122_v26 = vmax.f32 %v118_v22, 0.0 }
  0xe3   :  { %v121_v25 = vmax.f32 %v113_v24, 0.0 }
  0xe5   :  { %324 = vmatprep.mubr.msk.f32.mxu1 %vm138_vm1, %v121_v25 }
  0xe6   :  { %325 = vmatmul.mubr.msk.f32.vlgmr.msra.gmra.mrb[0].mxu1 %vm138_vm1, %v122_v26 }
 0x1b9   :  { %v326_v28 = vpop.f32.mrb[0].mxu1 }
 0x1ba   :  { %v211_v29 = vpop.f32.mrb[1].mxu1  ;;  %v217_v30 = vadd.f32 %v326_v28, %v276_v27 }
 0x1bb   :  { %v212_v31 = vadd.f32 %v276_v27, %v211_v29 }
 0x1bc   :  { %v221_v34 = vadd.f32 %v217_v30, %v27_v16 }
 0x1bd   :  { %v220_v32 = vadd.f32 %v212_v31, %v26_v5 }
 0x1be   :  { %v227_v35 = vsel %vm39_vm0, %v221_v34, 0.0 }
 0x1bf   :  { %v224_v33 = vsel %vm39_vm0, %v220_v32, 0.0 }
 0x1c0   :  { %225 = vadd.xlane.f32.xlu0 %v224_v33 }
 0x1c4   :  { %228 = vadd.xlane.f32.xlu0 %v227_v35 }
 0x24d   :  { %v226_v36 = vpop.xlane.xlu0 %225 }
 0x24e   :  { %v231_v37 = vmul.f32 0.03125, %v226_v36 }
 0x250   :  { %v233_v38 = vsub.f32 %v220_v32, %v231_v37 }
 0x251   :  { %v229_v39 = vpop.xlane.xlu0 %228 }
 0x252   :  { %v232_v40 = vmul.f32 0.03125, %v229_v39  ;;  %v235_v41 = vmul.f32 %v233_v38, %v233_v38 }
 0x254   :  { %v234_v42 = vsub.f32 %v221_v34, %v232_v40  ;;  %v237_v43 = vsel %vm39_vm0, %v235_v41, 0.0 }
 0x255   :  { %238 = vadd.xlane.f32.xlu1 %v237_v43 }
 0x256   :  { %v236_v44 = vmul.f32 %v234_v42, %v234_v42 }
 0x258   :  { %v240_v45 = vsel %vm39_vm0, %v236_v44, 0.0 }
 0x259   :  { %241 = vadd.xlane.f32.xlu1 %v240_v45 }
 0x2e2   :  { %v239_v46 = vpop.xlane.xlu1 %238 }
 0x2e3   :  { %v243_v47 = vmul.f32 0.03125, %v239_v46 }
 0x2e5   :  { %v245_v48 = vadd.f32 1e-05, %v243_v47 }
 0x2e6   :  { %v242_v49 = vpop.xlane.xlu1 %241 }
 0x2e7   :  { %351 = vrsqrt.f32 %v245_v48  ;;  %v244_v50 = vmul.f32 0.03125, %v242_v49 }
 0x2e9   :  { %v246_v51 = vadd.f32 1e-05, %v244_v50 }
 0x2eb   :  { %353 = vrsqrt.f32 %v246_v51 }
 0x2f1   :  { %v352_v52 = vpop.eup %351 }
 0x2f2   :  { %v249_v54 = vmul.f32 %v352_v52, %v233_v38 }
 0x2f4   :  { %v257_v56 = vmul.f32 %v279_v53, %v249_v54 }
 0x2f5   :  { %v354_v57 = vpop.eup %353 }
 0x2f6   :  { %v265_v58 = vadd.f32 %v280_v55, %v257_v56  ;;  %v250_v59 = vmul.f32 %v354_v57, %v234_v42 }
 0x2f8   :  { %267 = vst.msk [vmem:[%s470_s7] sm:$0xff] %vm39_vm0, %v265_v58  ;;  %v258_v60 = vmul.f32 %v279_v53, %v250_v59 }
 0x2fa   :  { %v266_v61 = vadd.f32 %v280_v55, %v258_v60 }
 0x2fc   :  { %268 = vst.msk [vmem:[%s470_s7 + $0x8] sm:$0xff] %vm39_vm0, %v266_v61 }

// kernel: transformer_decoder_layer_forward.3
= control target key start
LH: loop header
LB: loop body
LE: loop exit
PB: predicated region body
PF: predicated region fallthrough
CT: control target
= control target key end

     0   :  { %s1443_s24 = smov 0   ;;  %s1579_s0 = inlined_call_operand.vmem [shape: f32[2,8,32], index: 0, kind: input, shape index: {}]   ;;  %s1580_s1 = inlined_call_operand.vmem [shape: f32[32,96], index: 1, kind: input, shape index: {}]   ;;  %s1581_s2 = inlined_call_operand.vmem [shape: f32[1,96], index: 2, kind: input, shape index: {}]   ;;  %s1582_s3 = inlined_call_operand.vmem [shape: f32[32,32], index: 3, kind: input, shape index: {}]   ;;  %s1583_s4 = inlined_call_operand.vmem [shape: f32[1,32], index: 4, kind: input, shape index: {}]   ;;  %s1584_s5 = inlined_call_operand.vmem [shape: f32[1,32], index: 5, kind: input, shape index: {}]   ;;  %s1585_s6 = inlined_call_operand.vmem [shape: f32[1,32], index: 6, kind: input, shape index: {}]   ;;  %s1586_s7 = inlined_call_operand.vmem [shape: f32[2,8,32], index: 7, kind: output, shape index: {}]  }
   0x1 LB: > { %s1208_s25 = sadd.s32 4294967295, %s1384_s24   ;;  %p1212_p0 = scmp.ge.s32.totalorder %s1384_s24, 1  ;;  %s1384_s24 = sphi %s1443_s24, %s17_s24  }
   0x2   : > { %p236_p1 = scmp.lt.s32.totalorder %s1384_s24, 3 }
   0x4   : > { %p237_p2 = pnand %p1212_p0, %p236_p1 }
   0x5   : > { %v275_v0 = vld [vmem:[%s1580_s1] sm:$0xff] (!%p237_p2)  ;;  %v276_v1 = vld [vmem:[%s1580_s1 + $0x8] sm:$0xff] (!%p237_p2)  ;;  %v277_v2 = vld [vmem:[%s1580_s1 + $0x10] sm:$0xff] (!%p237_p2)  ;;  %v1386_v3 = vmov (!%p237_p2), 0.0|0.0   ;;  %vm1387_vm0 = vmmov (!%p237_p2), 0   ;;  %v1388_v6 = vmov (!%p237_p2), 0.0  }
   0x6   : > { %240 = sbr.rel (%p237_p2) target bundleno = 2311 (0x907), region = 48  ;;  %1323 = vmatprep.subr.bf16.mxu0 (!%p237_p2), %v1386_v3  ;;  %v1324_v4 = vpack.c.bf16 (!%p237_p2), %v276_v1, %v275_v0  ;;  %v278_v5 = vld [vmem:[%s1580_s1 + $0x18] sm:$0xff] (!%p237_p2)  ;;  %1269 = vmatprep.mubr.msk.f32.mxu0 (!%p237_p2), %vm1387_vm0, %v1388_v6  ;;  %p266_p3 = scmp.lt.s32.totalorder (!%p237_p2), %s1208_s25, 1  ;;  %vm286_vm1 = vcmask (!%p237_p2), 261120   ;;  %v1215_v9 = vld [vmem:[%s1581_s2] ss:$0 sm:$0xff] (!%p237_p2) }
   0x7   : > { %1272 = vmatprep.subr.mxu1 (!%p237_p2), %v1388_v6  ;;  %1274 = vmatprep.mubr.msk.f32.mxu1 (!%p237_p2), %vm1387_vm0, %v1388_v6  ;;  %v1327_v7 = vpack.c.bf16 (!%p237_p2), %v278_v5, %v277_v2  ;;  %s1389_s17 = smov (!%p237_p2), 64   ;;  %s1390_s18 = smov (!%p237_p2), 96   ;;  %vm364_vm2 = vcmask (!%p237_p2), 64512   ;;  %vm1035_vm3 = vcmask (!%p237_p2), 130048   ;;  %vm1037_vm4 = vcmask (!%p237_p2), 195584  }
   0x8   : > { %1325 = vmatpush3.bf16.msra.mxu0 (!%p237_p2), %v1324_v4  ;;  %s1391_s19 = smov (!%p237_p2), 88   ;;  %s1392_s20 = smov (!%p237_p2), 120  }
   0x9   : > { %1326 = vmatprep.subr.bf16.mxu0 (!%p237_p2), %v1386_v3  ;;  %s1393_s21 = smov (!%p237_p2), 80   ;;  %s1394_s22 = smov (!%p237_p2), 72  }
   0xa   : > { %s1395_s23 = smov (!%p237_p2), 112   ;;  %s1396_s26 = smov (!%p237_p2), 104  }
   0xb   : > { %s1397_s27 = smov (!%p237_p2), 56   ;;  %s1398_s28 = smov (!%p237_p2), 48  }
   0xc   : > { %1328 = vmatpush3.bf16.msra.mxu0 (!%p237_p2), %v1327_v7  ;;  %s1399_s29 = smov (!%p237_p2), 40   ;;  %s1400_s16 = smov (!%p237_p2), 8  }
   0xd   : > { %s1588_s25 = smov (!%p266_p3, %s1208_s25), 1  ;;  %1292 = vmatprep.subr.mxu0 %v1388_v6 }
   0xe   : > { %s1213_s11 = sshll.u32 %s1588_s25, 3 }
   0xf   : > { %s269_s14 = scalar_lea.vmem %s1579_s0, %s1213_s11 }
  0x10   : > { %v1478_v8 = vld [vmem:[%s269_s14] sm:$0xff] }
  0x11   : > { %1270 = vmatmul.mubr.msk.f32.vlgmr.msra.gmra.mrb[0].mxu0 %vm286_vm1, %v1478_v8 }
  0x12   : > { %1294 = vmatprep.mubr.msk.f32.mxu0 %vm1387_vm0, %v1388_v6 }
  0xe4   : > { %v356_v10 = vpop.f32.mrb[0].mxu0 }
  0xe5   : > { %v1488_v11 = vadd.f32 %v1215_v9, %v356_v10  ;;  %v1271_v12 = vpop.f32.mrb[1].mxu0  ;;  %v1039_v10 = vld [vmem:[%s1582_s3] sm:$0xff] }
  0xe7   : > { %451 = vrot.lane.b32.xlu1 %v1488_v11, %s1389_s17  ;;  %362 = vrot.lane.b32.xlu0 %v1488_v11, %s1390_s18  ;;  %v360_v13 = vmul.f32 0.35355338, %v1488_v11  ;;  %s1401_s17 = smov 16   ;;  %s1402_s18 = smov 24  }
  0xeb   : > { %529 = vrot.lane.b32.xlu1 %v1488_v11, %s1391_s19 }
  0xef   : > { %527 = vrot.lane.b32.xlu1 %v360_v13, %s1392_s20 }
  0xf3   : > { %694 = vrot.lane.b32.xlu1 %v1488_v11, %s1393_s21 }
 0x159   : > { %v452_v14 = vpop.permute.xlu1 %451  ;;  %v363_v15 = vpop.permute.xlu0 %362 }
 0x15a   : > { %1273 = vmatpush3.xpose.msk.msra.mxu1 %vm364_vm2, %v363_v15 }
 0x15b   : > { %1277 = vmatprep.subr.mxu1 %v1388_v6 }
 0x15d   : > { %v530_v16 = vpop.permute.xlu1 %529  ;;  %1275 = vmatmul.mubr.msk.f32.vlgmr.msra.gmra.mrb[0].mxu1 %vm364_vm2, %v360_v13 }
 0x15e   : > { %1278 = vmatpush3.msra.mxu1 %v452_v14  ;;  %1279 = vmatprep.mubr.msk.f32.mxu1 %vm1387_vm0, %v1388_v6 }
 0x15f   : > { %1282 = vmatprep.subr.mxu1 %v1388_v6 }
 0x161   : > { %v528_v17 = vpop.permute.xlu1 %527 }
 0x165   : > { %v695_v18 = vpop.permute.xlu1 %694 }
 0x166   : > { %1293 = vmatpush3.xpose.msk.msra.mxu0 %vm364_vm2, %v695_v18 }
 0x167   : > { %1302 = vmatprep.subr.mxu0 %v1388_v6 }
 0x230   : > { %v436_v19 = vpop.f32.mrb[0].mxu1 }
 0x231   : > { %v1276_v20 = vpop.f32.mrb[1].mxu1  ;;  %v440_v21 = vsel %vm364_vm2, %v436_v19, -inf }
 0x232   : > { %441 = vmax.xlane.f32.xlu0 %v440_v21 }
 0x248   : > { %859 = vrot.lane.b32.xlu0 %v1488_v11, %s1394_s22 }
 0x2bf   : > { %v442_v22 = vpop.xlane.xlu0 %441 }
 0x2c0   : > { %v443_v23 = vsub.f32 %v436_v19, %v442_v22 }
 0x2c2   : > { %v444_v24 = vmul.f32 1.442695, %v443_v23 }
 0x2c3   : > { %v860_v29 = vpop.permute.xlu0 %859 }
 0x2c4   : > { %1360 = vpow2.f32 %v444_v24 }
 0x2ce   : > { %v1361_v25 = vpop.eup %1360 }
 0x2cf   : > { %v446_v26 = vsel %vm364_vm2, %v1361_v25, 0.0 }
 0x2d0   : > { %447 = vadd.xlane.f32.xlu1 %v446_v26  ;;  %v1229_v26 = vld [vmem:[%s1583_s4] ss:$0 sm:$0xff] }
 0x2e1   : > { %692 = vrot.lane.b32.xlu1 %v360_v13, %s1395_s23 }
 0x2e5   : > { %857 = vrot.lane.b32.xlu1 %v360_v13, %s1396_s26  ;;  %v1041_v13 = vld [vmem:[%s1582_s3 + $0x10] sm:$0xff] }
 0x35d   : > { %v448_v27 = vpop.xlane.xlu1 %447 }
 0x35e   : > { %1362 = vrcp.f32 %v448_v27 }
 0x361   : > { %v693_v28 = vpop.permute.xlu1 %692 }
 0x362   : > { %1295 = vmatmul.mubr.msk.f32.vlgmr.msra.gmra.mrb[2].mxu0 %vm364_vm2, %v693_v28 }
 0x363   : > { %1303 = vmatpush3.xpose.msk.msra.mxu0 %vm364_vm2, %v860_v29  ;;  %1304 = vmatprep.mubr.msk.f32.mxu0 %vm1387_vm0, %v1388_v6 }
 0x364   : > { %1329 = vmatprep.subr.bf16.mxu0 %v1386_v3 }
 0x365   : > { %v858_v30 = vpop.permute.xlu1 %857 }
 0x366   : > { %1305 = vmatmul.mubr.msk.f32.vlgmr.msra.gmra.mrb[4].mxu0 %vm364_vm2, %v858_v30 }
 0x367   : > { %1320 = vmatprep.mubr.msk.f32.mxu0 %vm1387_vm0, %v1388_v6 }
 0x368   : > { %v1363_v31 = vpop.eup %1362 }
 0x369   : > { %v450_v32 = vmul.f32 %v1363_v31, %v1361_v25 }
 0x36b   : > { %1280 = vmatmul.mubr.msk.f32.vlgmr.msra.gmra.mrb[2].mxu1 %vm364_vm2, %v450_v32 }
 0x36c   : > { %1283 = vmatpush3.xpose.msk.msra.mxu1 %vm364_vm2, %v530_v16  ;;  %1284 = vmatprep.mubr.msk.f32.mxu1 %vm1387_vm0, %v1388_v6 }
 0x36d   : > { %1287 = vmatprep.subr.mxu1 %v1388_v6 }
 0x36f   : > { %1285 = vmatmul.mubr.msk.f32.vlgmr.msra.gmra.mrb[4].mxu1 %vm364_vm2, %v528_v17 }
 0x370   : > { %1289 = vmatprep.mubr.msk.f32.mxu1 %vm1387_vm0, %v1388_v6 }
 0x435   : > { %v766_v33 = vpop.f32.mrb[2].mxu0 }
 0x436   : > { %v1296_v34 = vpop.f32.mrb[3].mxu0  ;;  %v770_v35 = vsel %vm364_vm2, %v766_v33, -inf }
 0x437   : > { %771 = vmax.xlane.f32.xlu0 %v770_v35 }
 0x439   : > { %v931_v36 = vpop.f32.mrb[4].mxu0 }
 0x43a   : > { %v1306_v37 = vpop.f32.mrb[5].mxu0  ;;  %v935_v43 = vsel %vm364_vm2, %v931_v36, -inf }
 0x43e   : > { %v1523_v38 = vpop.f32.mrb[2].mxu1 }
 0x43f   : > { %v1281_v39 = vpop.f32.mrb[3].mxu1 }
 0x442   : > { %v601_v40 = vpop.f32.mrb[4].mxu1 }
 0x443   : > { %v1286_v41 = vpop.f32.mrb[5].mxu1  ;;  %v605_v42 = vsel %vm364_vm2, %v601_v40, -inf }
 0x444   : > { %606 = vmax.xlane.f32.xlu1 %v605_v42  ;;  %v1232_v42 = vld [vmem:[%s1585_s6] ss:$0 sm:$0xff] }
 0x448   : > { %936 = vmax.xlane.f32.xlu1 %v935_v43 }
 0x4c4   : > { %v772_v44 = vpop.xlane.xlu0 %771 }
 0x4c5   : > { %v773_v45 = vsub.f32 %v766_v33, %v772_v44 }
 0x4c7   : > { %v774_v46 = vmul.f32 1.442695, %v773_v45 }
 0x4c9   : > { %1364 = vpow2.f32 %v774_v46 }
 0x4d1   : > { %v607_v47 = vpop.xlane.xlu1 %606 }
 0x4d2   : > { %v608_v55 = vsub.f32 %v601_v40, %v607_v47 }
 0x4d3   : > { %v1365_v48 = vpop.eup %1364 }
 0x4d4   : > { %v776_v49 = vsel %vm364_vm2, %v1365_v48, 0.0  ;;  %v609_v56 = vmul.f32 1.442695, %v608_v55 }
 0x4d5   : > { %777 = vadd.xlane.f32.xlu1 %v776_v49  ;;  %v937_v50 = vpop.xlane.xlu1 %936 }
 0x4d6   : > { %v938_v51 = vsub.f32 %v931_v36, %v937_v50 }
 0x4d8   : > { %v939_v52 = vmul.f32 1.442695, %v938_v51 }
 0x4da   : > { %1366 = vpow2.f32 %v939_v52 }
 0x4db   : > { %1368 = vpow2.f32 %v609_v56 }
 0x4e4   : > { %v1367_v53 = vpop.eup %1366 }
 0x4e5   : > { %v941_v54 = vsel %vm364_vm2, %v1367_v53, 0.0  ;;  %v1369_v57 = vpop.eup %1368 }
 0x4e6   : > { %616 = vrot.lane.b32.xlu1 %v1488_v11, %s1397_s27  ;;  %942 = vadd.xlane.f32.xlu0 %v941_v54  ;;  %v611_v58 = vsel %vm364_vm2, %v1369_v57, 0.0 }
 0x4fc   : > { %781 = vrot.lane.b32.xlu0 %v1488_v11, %s1398_s28 }
 0x50a   : > { %612 = vadd.xlane.f32.xlu1 %v611_v58 }
 0x51b   : > { %946 = vrot.lane.b32.xlu1 %v1488_v11, %s1399_s29  ;;  %v1040_v11 = vld [vmem:[%s1582_s3 + $0x8] sm:$0xff]  ;;  %s273_s29 = scalar_lea.vmem %s1586_s7, %s1213_s11 }
 0x51c   : > { %v1330_v12 = vpack.c.bf16 %v1040_v11, %v1039_v10 }
 0x51e   : > { %1331 = vmatpush3.bf16.msra.mxu0 %v1330_v12 }
 0x51f   : > { %1332 = vmatprep.subr.bf16.mxu0 %v1386_v3 }
 0x562   : > { %v778_v59 = vpop.xlane.xlu1 %777 }
 0x566   : > { %v617_v60 = vpop.permute.xlu1 %616 }
 0x567   : > { %1288 = vmatpush3.msra.mxu1 %v617_v60 }
 0x568   : > { %1297 = vmatprep.subr.mxu1 %v1388_v6 }
 0x573   : > { %v943_v62 = vpop.xlane.xlu0 %942 }
 0x577   : > { %v782_v2 = vpop.permute.xlu0 %781 }
 0x597   : > { %v613_v61 = vpop.xlane.xlu1 %612 }
 0x598   : > { %1370 = vrcp.f32 %v613_v61 }
 0x599   : > { %1372 = vrcp.f32 %v778_v59 }
 0x59a   : > { %1374 = vrcp.f32 %v943_v62 }
 0x59b   : > { %v947_v7 = vpop.permute.xlu1 %946 }
 0x5a2   : > { %v1371_v63 = vpop.eup %1370 }
 0x5a3   : > { %v615_v0 = vmul.f32 %v1371_v63, %v1369_v57  ;;  %v1373_v1 = vpop.eup %1372 }
 0x5a4   : > { %v780_v4 = vmul.f32 %v1373_v1, %v1365_v48  ;;  %v1375_v5 = vpop.eup %1374 }
 0x5a5   : > { %1290 = vmatmul.mubr.msk.f32.vlgmr.msra.gmra.mrb[6].mxu1 %vm364_vm2, %v615_v0  ;;  %v945_v9 = vmul.f32 %v1375_v5, %v1367_v53 }
 0x5a6   : > { %1298 = vmatpush3.msra.mxu1 %v782_v2  ;;  %1299 = vmatprep.mubr.msk.f32.mxu1 %vm1387_vm0, %v1388_v6 }
 0x5a7   : > { %1307 = vmatprep.subr.mxu1 %v1388_v6 }
 0x5a9   : > { %1300 = vmatmul.mubr.msk.f32.vlgmr.msra.gmra.mrb[8].mxu1 %vm364_vm2, %v780_v4 }
 0x5aa   : > { %1308 = vmatpush3.msra.mxu1 %v947_v7  ;;  %1309 = vmatprep.mubr.msk.f32.mxu1 %vm1387_vm0, %v1388_v6  ;;  %v1042_v6 = vld [vmem:[%s1582_s3 + $0x18] sm:$0xff] }
 0x5ab   : > { %v1333_v14 = vpack.c.bf16 %v1042_v6, %v1041_v13 }
 0x5ad   : > { %1310 = vmatmul.mubr.msk.f32.vlgmr.msra.gmra.mrb[10].mxu1 %vm364_vm2, %v945_v9  ;;  %1334 = vmatpush3.bf16.msra.mxu0 %v1333_v14 }
 0x678   : > { %v688_v15 = vpop.f32.mrb[6].mxu1 }
 0x679   : > { %1023 = vrot.lane.b32.xlu1 %v688_v15, %s1400_s16  ;;  %v1291_v16 = vpop.f32.mrb[7].mxu1 }
 0x67c   : > { %v853_v17 = vpop.f32.mrb[8].mxu1 }
 0x67d   : > { %1027 = vrot.lane.b32.xlu0 %v853_v17, %s1401_s17  ;;  %v1301_v18 = vpop.f32.mrb[9].mxu1 }
 0x680   : > { %v1018_v19 = vpop.f32.mrb[10].mxu1 }
 0x681   : > { %1031 = vrot.lane.b32.xlu1 %v1018_v19, %s1402_s18  ;;  %v1311_v3 = vpop.f32.mrb[11].mxu1 }
 0x6eb   : > { %v1024_v20 = vpop.permute.xlu1 %1023 }
 0x6ec   : > { %v1034_v22 = vsel %vm364_vm2, %v1523_v38, %v1024_v20 }
 0x6ef   : > { %v1028_v21 = vpop.permute.xlu0 %1027 }
 0x6f0   : > { %v1036_v23 = vsel %vm1035_vm3, %v1034_v22, %v1028_v21 }
 0x6f3   : > { %v1032_v24 = vpop.permute.xlu1 %1031 }
 0x6f4   : > { %v1038_v25 = vsel %vm1037_vm4, %v1036_v23, %v1032_v24 }
 0x6f5   : > { %1321 = vmatmul.mubr.msk.f32.vlgmr.msra.gmra.mrb[6].mxu0 %vm286_vm1, %v1038_v25 }
 0x7c8   : > { %v1119_v27 = vpop.f32.mrb[6].mxu0 }
 0x7c9   : > { %v1120_v28 = vadd.f32 %v1229_v26, %v1119_v27  ;;  %v1322_v29 = vpop.f32.mrb[7].mxu0 }
 0x7cb   : > { %v1123_v30 = vadd.f32 %v1120_v28, %v1478_v8  ;;  %v1231_v8 = vld [vmem:[%s1584_s5] ss:$0 sm:$0xff] }
 0x7cd   : > { %v1126_v31 = vsel %vm286_vm1, %v1123_v30, 0.0 }
 0x7ce   : > { %1127 = vadd.xlane.f32.xlu0 %v1126_v31 }
 0x85b   : > { %v1128_v32 = vpop.xlane.xlu0 %1127 }
 0x85c   : > { %v1130_v33 = vmul.f32 0.03125, %v1128_v32 }
 0x85e   : > { %v1131_v34 = vsub.f32 %v1123_v30, %v1130_v33 }
 0x860   : > { %v1132_v35 = vmul.f32 %v1131_v34, %v1131_v34 }
 0x862   : > { %v1133_v36 = vsel %vm286_vm1, %v1132_v35, 0.0 }
 0x863   : > { %1134 = vadd.xlane.f32.xlu1 %v1133_v36 }
 0x8f0   : > { %v1135_v37 = vpop.xlane.xlu1 %1134 }
 0x8f1   : > { %v1136_v38 = vmul.f32 0.03125, %v1135_v37 }
 0x8f3   : > { %v1137_v39 = vadd.f32 1e-05, %v1136_v38 }
 0x8f5   : > { %1376 = vrsqrt.f32 %v1137_v39 }
 0x8ff   : > { %v1377_v40 = vpop.eup %1376 }
 0x900   : > { %v1139_v41 = vmul.f32 %v1377_v40, %v1131_v34 }
 0x902   : > { %v1146_v43 = vmul.f32 %v1231_v8, %v1139_v41 }
 0x904   : > { %v1153_v44 = vadd.f32 %v1232_v42, %v1146_v43 }
 0x906   : > { %1154 = vst.msk [vmem:[%s273_s29] sm:$0xff] %vm286_vm1, %v1153_v44 }
 0x907 PF: > { %s17_s24 = sadd.s32 1, %s1384_s24  }
 0x908   : > { %p14_p4 = scmp.ge.s32.totalorder %s17_s24, 4  }
 0x90a   :  { %16 = sbr.rel (!%p14_p4) target bundleno = 1 (0x1), region = 78 }

// kernel: transformer_decoder_layer_forward.4
= control target key start
LH: loop header
LB: loop body
LE: loop exit
PB: predicated region body
PF: predicated region fallthrough
CT: control target
= control target key end

     0   :  { %s2102_s0 = inlined_call_operand.vmem [shape: f32[2,8,32], index: 0, kind: input, shape index: {}]   ;;  %s2103_s1 = inlined_call_operand.vmem [shape: f32[2,8,32], index: 1, kind: input, shape index: {}]   ;;  %s2104_s2 = inlined_call_operand.vmem [shape: f32[32,32], index: 2, kind: input, shape index: {}]   ;;  %s2105_s3 = inlined_call_operand.vmem [shape: f32[1,32], index: 3, kind: input, shape index: {}]   ;;  %s2106_s4 = inlined_call_operand.vmem [shape: f32[32,64], index: 4, kind: input, shape index: {}]   ;;  %s2107_s5 = inlined_call_operand.vmem [shape: f32[1,64], index: 5, kind: input, shape index: {}]   ;;  %s2108_s6 = inlined_call_operand.vmem [shape: f32[32,32], index: 6, kind: input, shape index: {}]   ;;  %s2109_s7 = inlined_call_operand.vmem [shape: f32[1,32], index: 7, kind: input, shape index: {}]   ;;  %s2110_s8 = inlined_call_operand.vmem [shape: f32[1,32], index: 8, kind: input, shape index: {}]   ;;  %s2111_s9 = inlined_call_operand.vmem [shape: f32[1,32], index: 9, kind: input, shape index: {}]   ;;  %s2112_s10 = inlined_call_operand.vmem [shape: f32[2,8,32], index: 10, kind: output, shape index: {0}]   ;;  %s2113_s11 = inlined_call_operand.hbm [shape: f32[2,8,8], index: 11, kind: output, shape index: {1}]  }
   0x1   :  { %2116 = sst [smem:[#allocation5_spill]] %s2102_s0 }
   0x2   :  { %2117 = sst [smem:[#allocation6_spill]] %s2103_s1 }
   0x3   :  { %2118 = sst [smem:[#allocation7_spill]] %s2104_s2 }
   0x4   :  { %2119 = sst [smem:[#allocation8_spill]] %s2105_s3 }
   0x5   :  { %17 = vsyncpa [#allocation3], 0 }
   0x6   :  { %19 = vsyncpa [#allocation3 + $0x1], 0  ;;  %s1857_s17 = smov 0   ;;  %s1859_s18 = smov 0  }
   0x7   :  { %s1861_s19 = smov 0   ;;  %s1863_s20 = smov 0  }
   0x8 LB: > { %s1878_s21 = sadd.s32 4294967295, %s1781_s20   ;;  %s1495_s22 = sadd.s32 4294967294, %s1781_s20   ;;  %s1781_s20 = sphi %s1863_s20, %s2131_s20   ;;  %s1777_s19 = sphi %s1861_s19, %s2130_s19   ;;  %s1773_s18 = sphi %s1859_s18, %s2129_s18   ;;  %s1769_s17 = sphi %s1857_s17, %s2128_s17  }
   0x9   : > { %s1882_s23 = sadd.s32 1, %s1781_s20   ;;  %s278_s24 = sadd.s32 1, %s1777_s19 }
   0xa   : > { %s275_s25 = ssub.s32 %s1781_s20, %s1882_s23  ;;  %p288_p0 = scmp.ne.s32.totalorder %s1777_s19, %s1773_s18 }
   0xb   : > { %p276_p1 = scmp.eq.s32.totalorder %s275_s25, 0  ;;  %p289_p2 = scmp.eq.s32.totalorder %s1878_s21, 1 }
   0xc   : > { %p294_p3 = scmp.ne.s32.totalorder %s1773_s18, %s1769_s17  ;;  %p295_p4 = scmp.eq.s32.totalorder %s1495_s22, 1 }
   0xd   : > { %s1893_s26 = scalar_select %p276_p1, %s1777_s19, %s278_s24  }
   0xe   : > { %p1895_p5 = por %p289_p2, %p288_p0  ;;  %p1899_p6 = por %p295_p4, %p294_p3 }
   0xf   : > { %p1498_p7 = scmp.ge.s32.totalorder %s1781_s20, 1  ;;  %p351_p8 = scmp.lt.s32.totalorder %s1781_s20, 3 }
  0x11   : > { %p352_p9 = pnand %p1498_p7, %p351_p8 }
  0x12   : > { %v498_v0 = vld [vmem:[%s2106_s4] sm:$0xff] (!%p352_p9)  ;;  %v499_v1 = vld [vmem:[%s2106_s4 + $0x8] sm:$0xff] (!%p352_p9)  ;;  %s2122_s2 = sld [smem:[#allocation7_spill]] (!%p352_p9)  ;;  %v1783_v3 = vmov (!%p352_p9), 0.0|0.0   ;;  %v500_v6 = vld [vmem:[%s2106_s4 + $0x10] sm:$0xff] (!%p352_p9)  ;;  %p398_p10 = scmp.lt.s32.totalorder (!%p352_p9), %s1878_s21, 1 }
  0x13   : > { %355 = sbr.rel (%p352_p9) target bundleno = 1758 (0x6de), region = 60  ;;  %1637 = vmatprep.subr.bf16.mxu1 (!%p352_p9), %v1783_v3  ;;  %1631 = vmatprep.subr.bf16.mxu0 (!%p352_p9), %v1783_v3  ;;  %v1638_v4 = vpack.c.bf16 (!%p352_p9), %v499_v1, %v498_v0  ;;  %v501_v7 = vld [vmem:[%s2106_s4 + $0x18] sm:$0xff] (!%p352_p9)  ;;  %vm1784_vm0 = vmmov (!%p352_p9), 0   ;;  %v1785_v11 = vmov (!%p352_p9), 0.0   ;;  %s2123_s1 = sld [smem:[#allocation6_spill]] (!%p352_p9)  ;;  %vm423_vm1 = vcmask (!%p352_p9), 261120  }
  0x14   : > { %1577 = vmatprep.mubr.msk.f32.mxu1 (!%p352_p9), %vm1784_vm0, %v1785_v11  ;;  %1566 = vmatprep.mubr.msk.f32.mxu0 (!%p352_p9), %vm1784_vm0, %v1785_v11  ;;  %v1641_v12 = vpack.c.bf16 (!%p352_p9), %v501_v7, %v500_v6  ;;  %s2124_s0 = sld [smem:[#allocation5_spill]] (!%p352_p9)  ;;  %v1505_v16 = vld [vmem:[%s2107_s5] ss:$0 sm:$0xff] (!%p352_p9)  ;;  %s2125_s3 = sld [smem:[#allocation8_spill]] (!%p352_p9)  ;;  %vm582_vm2 = vcmask (!%p352_p9), 64512   ;;  %vm1257_vm3 = vcmask (!%p352_p9), 130048  }
  0x15   : > { %1639 = vmatpush3.bf16.msra.mxu1 (!%p352_p9), %v1638_v4  ;;  %s1786_s25 = smov (!%p352_p9), 112   ;;  %s1788_s30 = smov (!%p352_p9), 104   ;;  %vm1259_vm4 = vcmask (!%p352_p9), 195584  }
  0x16   : > { %1640 = vmatprep.subr.bf16.mxu1 (!%p352_p9), %v1783_v3  ;;  %s1789_s12 = smov (!%p352_p9), 96   ;;  %s1791_s14 = smov (!%p352_p9), 72  }
  0x17   : > { %s1792_s15 = smov (!%p352_p9), 88  }
  0x18   : > { %v412_v2 = vld [vmem:[%s2122_s2] sm:$0xff] (!%p352_p9)  ;;  %v413_v5 = vld [vmem:[%s2122_s2 + $0x8] sm:$0xff] (!%p352_p9)  ;;  %v414_v9 = vld [vmem:[%s2122_s2 + $0x10] sm:$0xff] (!%p352_p9) }
  0x19   : > { %v1632_v8 = vpack.c.bf16 (!%p352_p9), %v413_v5, %v412_v2  ;;  %v415_v10 = vld [vmem:[%s2122_s2 + $0x18] sm:$0xff] (!%p352_p9)  ;;  %1642 = vmatpush3.bf16.msra.mxu1 (!%p352_p9), %v1641_v12 }
  0x1a   : > { %s399_s16 = scalar_select %p398_p10, %s1878_s21, 1  ;;  %v1635_v13 = vpack.c.bf16 %v415_v10, %v414_v9  ;;  %1580 = vmatprep.subr.mxu1 %v1785_v11  ;;  %v1503_v17 = vld [vmem:[%s2125_s3] ss:$0 sm:$0xff] }
  0x1b   : > { %1633 = vmatpush3.bf16.msra.mxu0 %v1632_v8 }
  0x1c   : > { %1634 = vmatprep.subr.bf16.mxu0 %v1783_v3  ;;  %s1939_s22 = sshll.u32 %s399_s16, 3  ;;  %s2114_s16 = sand.u32 1, %s1773_s18  }
  0x1d   : > { %s405_s29 = scalar_lea.vmem %s2123_s1, %s1939_s22  ;;  %s401_s13 = scalar_lea.vmem %s2124_s0, %s1939_s22 }
  0x1e   : > { %v411_v14 = vld [vmem:[%s405_s29] sm:$0xff]  ;;  %s1787_s29 = smov 120   ;;  %s2019_s24 = sshll.u32 %s2114_s16, 3 }
  0x1f   : > { %1636 = vmatpush3.bf16.msra.mxu0 %v1635_v13  ;;  %v1949_v15 = vld [vmem:[%s401_s13] sm:$0xff]  ;;  %1578 = vmatmul.mubr.msk.f32.vlgmr.msra.gmra.mrb[0].mxu1 %vm423_vm1, %v411_v14  ;;  %s1790_s13 = smov 80   ;;  %s2127_s16 = sand.u32 1, %s1773_s18  }
  0x20   : > { %1590 = vmatprep.subr.mxu0 %v1785_v11  ;;  %1582 = vmatprep.mubr.msk.f32.mxu1 %vm1784_vm0, %v1785_v11  ;;  %s1796_s1 = smov [#allocation2]  }
  0x21   : > { %s1723_s2 = sshll.u32 %s1796_s1, 4  ;;  %s1724_s2 = int_to_ptr.vmem [resolvable:$false] %s1723_s2 }
  0x22   : > { %1567 = vmatmul.mubr.msk.f32.vlgmr.msra.gmra.mrb[0].mxu0 %vm423_vm1, %v1949_v15  ;;  %s1725_s3 = scalar_lea.vmem %s1724_s2, 256 }
  0x23   : > { %1592 = vmatprep.mubr.msk.f32.mxu0 %vm1784_vm0, %v1785_v11 }
  0xf2   : > { %v578_v18 = vpop.f32.mrb[0].mxu1 }
  0xf3   : > { %v1966_v19 = vadd.f32 %v1505_v16, %v578_v18  ;;  %v1579_v21 = vpop.f32.mrb[1].mxu1 }
  0xf5   : > { %v493_v20 = vpop.f32.mrb[0].mxu0  ;;  %914 = vrot.lane.b32.xlu1 %v1966_v19, %s1786_s25  ;;  %748 = vrot.lane.b32.xlu0 %v1966_v19, %s1787_s29 }
  0xf6   : > { %v494_v22 = vadd.f32 %v1503_v17, %v493_v20  ;;  %v1568_v23 = vpop.f32.mrb[1].mxu0  ;;  %1581 = vmatpush3.xpose.msk.msra.mxu1 %vm582_vm2, %v1966_v19 }
  0xf7   : > { %1585 = vmatprep.subr.mxu1 %v1785_v11 }
  0xf8   : > { %v497_v24 = vmul.f32 0.35355338, %v494_v22 }
  0xfa   : > { %1583 = vmatmul.mubr.msk.f32.vlgmr.msra.gmra.mrb[2].mxu1 %vm582_vm2, %v497_v24  ;;  %912 = vrot.lane.b32.xlu1 %v497_v24, %s1786_s25  ;;  %s2115_s25 = scalar_lea.vmem [#allocation2], %s2019_s24 }
  0xfb   : > { %746 = vrot.lane.b32.xlu0 %v497_v24, %s1787_s29  ;;  %1587 = vmatprep.mubr.msk.f32.mxu1 %vm1784_vm0, %v1785_v11  ;;  %s1793_s29 = smov 8  }
  0xfe   : > { %1078 = vrot.lane.b32.xlu1 %v497_v24, %s1788_s30  ;;  %v1262_v24 = vld [vmem:[%s2108_s6 + $0x8] sm:$0xff] }
  0xff   : > { %1080 = vrot.lane.b32.xlu0 %v1966_v19, %s1788_s30  ;;  %s1794_s30 = smov 16  }
 0x167   : > { %v749_v25 = vpop.permute.xlu0 %748  ;;  %v915_v26 = vpop.permute.xlu1 %914 }
 0x168   : > { %1591 = vmatpush3.xpose.msk.msra.mxu0 %vm582_vm2, %v749_v25 }
 0x169   : > { %1600 = vmatprep.subr.mxu0 %v1785_v11 }
 0x16c   : > { %v913_v28 = vpop.permute.xlu1 %912 }
 0x16d   : > { %v747_v27 = vpop.permute.xlu0 %746 }
 0x16e   : > { %1593 = vmatmul.mubr.msk.f32.vlgmr.msra.gmra.mrb[2].mxu0 %vm582_vm2, %v747_v27  ;;  %v1264_v27 = vld [vmem:[%s2108_s6 + $0x18] sm:$0xff] }
 0x16f   : > { %1601 = vmatpush3.xpose.msk.msra.mxu0 %vm582_vm2, %v915_v26  ;;  %1602 = vmatprep.mubr.msk.f32.mxu0 %vm1784_vm0, %v1785_v11  ;;  %v1263_v26 = vld [vmem:[%s2108_s6 + $0x10] sm:$0xff] }
 0x170   : > { %1610 = vmatprep.subr.mxu0 %v1785_v11  ;;  %v1079_v30 = vpop.permute.xlu1 %1078 }
 0x171   : > { %v1081_v29 = vpop.permute.xlu0 %1080 }
 0x172   : > { %1603 = vmatmul.mubr.msk.f32.vlgmr.msra.gmra.mrb[4].mxu0 %vm582_vm2, %v913_v28  ;;  %v1647_v28 = vpack.c.bf16 %v1264_v27, %v1263_v26 }
 0x173   : > { %1611 = vmatpush3.xpose.msk.msra.mxu0 %vm582_vm2, %v1081_v29  ;;  %1612 = vmatprep.mubr.msk.f32.mxu0 %vm1784_vm0, %v1785_v11 }
 0x174   : > { %1643 = vmatprep.subr.bf16.mxu0 %v1783_v3 }
 0x176   : > { %1613 = vmatmul.mubr.msk.f32.vlgmr.msra.gmra.mrb[6].mxu0 %vm582_vm2, %v1079_v30 }
 0x177   : > { %1628 = vmatprep.mubr.msk.f32.mxu0 %vm1784_vm0, %v1785_v11 }
 0x1cd   : > { %v655_v31 = vpop.f32.mrb[2].mxu1 }
 0x1ce   : > { %v1584_v32 = vpop.f32.mrb[3].mxu1  ;;  %v659_v33 = vsel %vm582_vm2, %v655_v31, -inf }
 0x1cf   : > { %660 = vmax.xlane.f32.xlu0 %v659_v33 }
 0x241   : > { %v820_v34 = vpop.f32.mrb[2].mxu0 }
 0x242   : > { %v1594_v35 = vpop.f32.mrb[3].mxu0  ;;  %v824_v36 = vsel %vm582_vm2, %v820_v34, -inf }
 0x243   : > { %825 = vmax.xlane.f32.xlu1 %v824_v36 }
 0x245   : > { %v986_v37 = vpop.f32.mrb[4].mxu0 }
 0x246   : > { %v1604_v38 = vpop.f32.mrb[5].mxu0  ;;  %v990_v39 = vsel %vm582_vm2, %v986_v37, -inf }
 0x247   : > { %991 = vmax.xlane.f32.xlu0 %v990_v39 }
 0x249   : > { %v1152_v40 = vpop.f32.mrb[6].mxu0 }
 0x24a   : > { %v1614_v41 = vpop.f32.mrb[7].mxu0  ;;  %v1156_v42 = vsel %vm582_vm2, %v1152_v40, -inf }
 0x24b   : > { %1157 = vmax.xlane.f32.xlu0 %v1156_v42 }
 0x254   : > { %670 = vrot.lane.b32.xlu1 %v1966_v19, %s1789_s12  ;;  %s1795_s12 = smov 24  }
 0x25c   : > { %v661_v43 = vpop.xlane.xlu0 %660 }
 0x25d   : > { %v662_v44 = vsub.f32 %v655_v31, %v661_v43 }
 0x25f   : > { %v663_v45 = vmul.f32 1.442695, %v662_v44 }
 0x261   : > { %1701 = vpow2.f32 %v663_v45 }
 0x26b   : > { %v1702_v46 = vpop.eup %1701 }
 0x26c   : > { %v665_v47 = vsel %vm582_vm2, %v1702_v46, 0.0 }
 0x278   : > { %666 = vadd.xlane.f32.xlu1 %v665_v47 }
 0x2d0   : > { %v826_v48 = vpop.xlane.xlu1 %825 }
 0x2d1   : > { %v827_v49 = vsub.f32 %v820_v34, %v826_v48 }
 0x2d3   : > { %v828_v50 = vmul.f32 1.442695, %v827_v49 }
 0x2d4   : > { %v671_v51 = vpop.permute.xlu1 %670  ;;  %v992_v52 = vpop.xlane.xlu0 %991 }
 0x2d5   : > { %1703 = vpow2.f32 %v828_v50  ;;  %v993_v53 = vsub.f32 %v986_v37, %v992_v52  ;;  %1586 = vmatpush3.msra.mxu1 %v671_v51 }
 0x2d6   : > { %1595 = vmatprep.subr.mxu1 %v1785_v11 }
 0x2d7   : > { %v994_v54 = vmul.f32 1.442695, %v993_v53 }
 0x2d8   : > { %v1158_v55 = vpop.xlane.xlu0 %1157 }
 0x2d9   : > { %1705 = vpow2.f32 %v994_v54  ;;  %v1159_v56 = vsub.f32 %v1152_v40, %v1158_v55  ;;  %v1519_v40 = vld [vmem:[%s2109_s7] ss:$0 sm:$0xff] }
 0x2db   : > { %v1160_v57 = vmul.f32 1.442695, %v1159_v56 }
 0x2dd   : > { %1707 = vpow2.f32 %v1160_v57 }
 0x2df   : > { %v1704_v58 = vpop.eup %1703 }
 0x2e0   : > { %v830_v59 = vsel %vm582_vm2, %v1704_v58, 0.0 }
 0x2e1   : > { %831 = vadd.xlane.f32.xlu0 %v830_v59 }
 0x2e3   : > { %v1706_v60 = vpop.eup %1705 }
 0x2e4   : > { %v996_v61 = vsel %vm582_vm2, %v1706_v60, 0.0 }
 0x2e5   : > { %997 = vadd.xlane.f32.xlu1 %v996_v61 }
 0x2e7   : > { %v1708_v62 = vpop.eup %1707 }
 0x2e8   : > { %v1162_v63 = vsel %vm582_vm2, %v1708_v62, 0.0 }
 0x2e9   : > { %1163 = vadd.xlane.f32.xlu0 %v1162_v63 }
 0x2f6   : > { %1002 = vrot.lane.b32.xlu1 %v1966_v19, %s1790_s13  ;;  %s1524_s13 = sshll.u32 %s1878_s21, 7 }
 0x2fa   : > { %1168 = vrot.lane.b32.xlu1 %v1966_v19, %s1791_s14  ;;  %s2126_s14 = scalar_lea.vmem [#allocation2], %s2019_s24 }
 0x2ff   : > { %836 = vrot.lane.b32.xlu0 %v1966_v19, %s1792_s15  ;;  %s1400_s15 = sshll.u32 %s2126_s14, 4  ;;  %s1401_s15 = int_to_ptr.vmem [resolvable:$true] %s1400_s15 }
 0x300   : > { %s1719_s0 = scalar_lea.vmem %s1401_s15, 128  ;;  %p1726_p0 = scmp.lt.s32.totalorder %s1401_s15, %s1724_s2 }
 0x301   : > { %p1720_p11 = scmp.ne.s32.totalorder %s1401_s15, %s1719_s0  ;;  %p1727_p1 = scmp.lt.s32.totalorder %s1725_s3, %s1719_s0 }
 0x303   : > { %p1721_p12 = pnand %p1720_p11, %p1895_p5  ;;  %p1728_p2 = por %p1727_p1, %p1726_p0 }
 0x305   : > { %v667_v0 = vpop.xlane.xlu1 %666  ;;  %p1722_p13 = pneg %p1721_p12 }
 0x306   : > { %1709 = vrcp.f32 %v667_v0 }
 0x307   : > { %p1729_p3 = pnand %p1728_p2, %p1722_p13 }
 0x310   : > { %v1710_v1 = vpop.eup %1709 }
 0x311   : > { %v669_v2 = vmul.f32 %v1710_v1, %v1702_v46 }
 0x313   : > { %1588 = vmatmul.mubr.msk.f32.vlgmr.msra.gmra.mrb[4].mxu1 %vm582_vm2, %v669_v2 }
 0x314   : > { %1597 = vmatprep.mubr.msk.f32.mxu1 %vm1784_vm0, %v1785_v11 }
 0x36e   : > { %v832_v4 = vpop.xlane.xlu0 %831 }
 0x36f   : > { %1711 = vrcp.f32 %v832_v4 }
 0x372   : > { %v998_v5 = vpop.xlane.xlu1 %997 }
 0x373   : > { %1713 = vrcp.f32 %v998_v5 }
 0x376   : > { %v1164_v6 = vpop.xlane.xlu0 %1163  ;;  %v1003_v9 = vpop.permute.xlu1 %1002 }
 0x377   : > { %1715 = vrcp.f32 %v1164_v6 }
 0x379   : > { %v1712_v7 = vpop.eup %1711 }
 0x37a   : > { %v834_v8 = vmul.f32 %v1712_v7, %v1704_v58  ;;  %v837_v10 = vpop.permute.xlu0 %836  ;;  %v1169_v14 = vpop.permute.xlu1 %1168 }
 0x37b   : > { %1596 = vmatpush3.msra.mxu1 %v837_v10 }
 0x37c   : > { %1598 = vmatmul.mubr.msk.f32.vlgmr.msra.gmra.mrb[6].mxu1 %vm582_vm2, %v834_v8  ;;  %1605 = vmatprep.subr.mxu1 %v1785_v11  ;;  %v835_v16 = vadd.f32 %v834_v8, %v669_v2 }
 0x37d   : > { %v1714_v12 = vpop.eup %1713  ;;  %1606 = vmatpush3.msra.mxu1 %v1003_v9  ;;  %1607 = vmatprep.mubr.msk.f32.mxu1 %vm1784_vm0, %v1785_v11 }
 0x37e   : > { %v1000_v13 = vmul.f32 %v1714_v12, %v1706_v60  ;;  %1615 = vmatprep.subr.mxu1 %v1785_v11 }
 0x380   : > { %1608 = vmatmul.mubr.msk.f32.vlgmr.msra.gmra.mrb[8].mxu1 %vm582_vm2, %v1000_v13  ;;  %v1001_v19 = vadd.f32 %v1000_v13, %v835_v16 }
 0x381   : > { %v1716_v17 = vpop.eup %1715  ;;  %1616 = vmatpush3.msra.mxu1 %v1169_v14  ;;  %1617 = vmatprep.mubr.msk.f32.mxu1 %vm1784_vm0, %v1785_v11  ;;  %v1261_v11 = vld [vmem:[%s2108_s6] sm:$0xff] }
 0x382   : > { %v1166_v18 = vmul.f32 %v1716_v17, %v1708_v62  ;;  %v1644_v25 = vpack.c.bf16 %v1262_v24, %v1261_v11 }
 0x384   : > { %1618 = vmatmul.mubr.msk.f32.vlgmr.msra.gmra.mrb[10].mxu1 %vm582_vm2, %v1166_v18  ;;  %v1167_v20 = vadd.f32 %v1166_v18, %v1001_v19  ;;  %1645 = vmatpush3.bf16.msra.mxu0 %v1644_v25 }
 0x385   : > { %1646 = vmatprep.subr.bf16.mxu0 %v1783_v3 }
 0x386   : > { %v1377_v21 = vmul.f32 0.25, %v1167_v20 }
 0x388   : > { %1378 = vst.msk [vmem:[%s2115_s25] sm:$0xff] %vm582_vm2, %v1377_v21  ;;  %1648 = vmatpush3.bf16.msra.mxu0 %v1647_v28  ;;  %s1384_s25 = scalar_lea.sflag [#allocation3], %s2127_s16 }
 0x3e6   : > { %v742_v22 = vpop.f32.mrb[4].mxu1 }
 0x3e7   : > { %v1589_v23 = vpop.f32.mrb[5].mxu1 }
 0x44f   : > { %v908_v29 = vpop.f32.mrb[6].mxu1 }
 0x450   : > { %1245 = vrot.lane.b32.xlu0 %v908_v29, %s1793_s29  ;;  %v1599_v30 = vpop.f32.mrb[7].mxu1 }
 0x453   : > { %v1074_v31 = vpop.f32.mrb[8].mxu1 }
 0x454   : > { %1249 = vrot.lane.b32.xlu1 %v1074_v31, %s1794_s30  ;;  %v1609_v32 = vpop.f32.mrb[9].mxu1 }
 0x457   : > { %v1240_v33 = vpop.f32.mrb[10].mxu1 }
 0x458   : > { %1253 = vrot.lane.b32.xlu0 %v1240_v33, %s1795_s12  ;;  %v1619_v3 = vpop.f32.mrb[11].mxu1  ;;  %s2053_s12 = scalar_lea.hbm %s2113_s11, %s1524_s13 }
 0x4c2   : > { %v1246_v34 = vpop.permute.xlu0 %1245 }
 0x4c3   : > { %v1256_v36 = vsel %vm582_vm2, %v742_v22, %v1246_v34 }
 0x4c6   : > { %v1250_v35 = vpop.permute.xlu1 %1249 }
 0x4c7   : > { %v1258_v37 = vsel %vm1257_vm3, %v1256_v36, %v1250_v35 }
 0x4ca   : > { %v1254_v38 = vpop.permute.xlu0 %1253 }
 0x4cb   : > { %v1260_v39 = vsel %vm1259_vm4, %v1258_v37, %v1254_v38 }
 0x4cc   : > { %1629 = vmatmul.mubr.msk.f32.vlgmr.msra.gmra.mrb[8].mxu0 %vm423_vm1, %v1260_v39 }
 0x59f   : > { %v1341_v41 = vpop.f32.mrb[8].mxu0 }
 0x5a0   : > { %v1342_v42 = vadd.f32 %v1519_v40, %v1341_v41  ;;  %v1630_v43 = vpop.f32.mrb[9].mxu0 }
 0x5a2   : > { %v1345_v44 = vadd.f32 %v1342_v42, %v1949_v15 }
 0x5a4   : > { %v1348_v45 = vsel %vm423_vm1, %v1345_v44, 0.0 }
 0x5a5   : > { %1349 = vadd.xlane.f32.xlu1 %v1348_v45 }
 0x632   : > { %v1350_v46 = vpop.xlane.xlu1 %1349 }
 0x633   : > { %v1352_v47 = vmul.f32 0.03125, %v1350_v46 }
 0x635   : > { %v1353_v48 = vsub.f32 %v1345_v44, %v1352_v47 }
 0x637   : > { %v1354_v49 = vmul.f32 %v1353_v48, %v1353_v48 }
 0x639   : > { %v1355_v50 = vsel %vm423_vm1, %v1354_v49, 0.0 }
 0x63a   : > { %1356 = vadd.xlane.f32.xlu0 %v1355_v50 }
 0x63b   : > { %1732 = shalt.err (!%p1729_p3)
}
 0x63c   : > { %s1733_s21 = scalar_lea.hbm %s2053_s12, 128  ;;  %s1737_s1 = scalar_lea.hbm %s2113_s11, 256 }
 0x63d   : > { %p1734_p4 = scmp.ne.s32.totalorder %s2053_s12, %s1733_s21  ;;  %p1738_p9 = scmp.lt.u32.totalorder %s2053_s12, %s2113_s11 }
 0x63e   : > { %p1739_p10 = scmp.lt.u32.totalorder %s1737_s1, %s1733_s21  ;;  %p1741_p12 = scmp.lt.u32.totalorder %s1733_s21, %s2053_s12 }
 0x63f   : > { %p1735_p7 = pnand %p1734_p4, %p1895_p5 }
 0x640   : > { %p1740_p11 = por %p1739_p10, %p1738_p9 }
 0x641   : > { %p1736_p8 = pneg %p1735_p7 }
 0x642   : > { %p1742_p13 = por %p1741_p12, %p1740_p11 }
 0x644   : > { %p1743_p0 = pnand %p1742_p13, %p1736_p8 }
 0x646   : > { %1746 = shalt.err (!%p1743_p0)
}
 0x647   : > { %1649 = dma.vmem_to_hbm [thread:$0]  (%p1895_p5), %s1401_s15, 128, %s2053_s12, %s1384_s25   ;;  %v1521_v54 = vld [vmem:[%s2110_s8] ss:$0 sm:$0xff] }
 0x648   : > { %v1522_v56 = vld [vmem:[%s2111_s9] ss:$0 sm:$0xff]  ;;  %s409_s21 = scalar_lea.vmem %s2112_s10, %s1939_s22 }
 0x6c7   : > { %v1357_v15 = vpop.xlane.xlu0 %1356 }
 0x6c8   : > { %v1358_v51 = vmul.f32 0.03125, %v1357_v15 }
 0x6ca   : > { %v1359_v52 = vadd.f32 1e-05, %v1358_v51 }
 0x6cc   : > { %1717 = vrsqrt.f32 %v1359_v52 }
 0x6d6   : > { %v1718_v53 = vpop.eup %1717 }
 0x6d7   : > { %v1361_v55 = vmul.f32 %v1718_v53, %v1353_v48 }
 0x6d9   : > { %v1368_v57 = vmul.f32 %v1521_v54, %v1361_v55 }
 0x6db   : > { %v1375_v58 = vadd.f32 %v1522_v56, %v1368_v57 }
 0x6dd   : > { %1376 = vst.msk [vmem:[%s409_s21] sm:$0xff] %vm423_vm1, %v1375_v58 }
 0x6de PF: > { %p1655_p5 = scmp.ge.s32.totalorder %s1781_s20, 2  ;;  %s1419_s15 = sand.u32 1, %s1769_s17  }
 0x6df   : > { %s1420_s12 = scalar_lea.sflag [#allocation3], %s1419_s15 }
 0x6e0   : > { %p1652_p1 = pnand %p1655_p5, %p1899_p6 }
 0x6e2   : > { %1764 = dma.done.wait (!%p1652_p1), %s1420_s12, 128  }
 0x6e3   : > { %1766 = vsyncadd (!%p1652_p1), %s1420_s12, 4294967168  ;;  %p22_p2 = scmp.ge.s32.totalorder %s1882_s23, 4   ;;  %s2128_s17 = smov %s1773_s18 }
 0x6e4   : > { %s2129_s18 = smov %s1777_s19  ;;  %s2130_s19 = smov %s1893_s26 }
 0x6e5   : > { %s2131_s20 = smov %s1882_s23  ;;  %24 = sbr.rel (!%p22_p2) target bundleno = 8 (0x8), region = 110 }
 0x6ec   :  { %1425 = vsyncpa [#allocation3], 1 }
 0x6ed   :  { %1427 = vsyncpa [#allocation3 + $0x1], 1 }

</bundles_post_ra>
